<compile_context>
chip_gen: v7x
topology: tpu7x:2x2x1
jax: 0.10.0
libtpu: 0.0.40
codegen_flags: <defaults>
</compile_context>

<pallas_src>
import functools

import jax
import jax.numpy as jnp
from jax import lax
from jax.experimental import pallas as pl
from jax.experimental.pallas import tpu as pltpu


# Conservative per-kernel VMEM budget for the double-buffered tiles: fits the
# v5e 16 MiB scoped default and leaves headroom on v6e/v7x.
_VMEM_TILE_BUDGET = 12 * 1024 * 1024


def _fused_linear_act_kernel(x_ref, w_ref, b_ref, o_ref, *, compute_dtype):
    k = pl.program_id(2)

    @pl.when(k == 0)
    def _():
        o_ref[...] = jnp.zeros_like(o_ref)

    a = x_ref[...]
    w = w_ref[...]
    if compute_dtype is not None:
        # In-kernel cast (vregs only) -> no extra wrapper-level HBM cast pass.
        a = a.astype(compute_dtype)
        w = w.astype(compute_dtype)

    # Canonical (tm, tk) x (tk, tn) MXU matmul with f32 accumulation directly
    # into the VMEM-resident output block (block index independent of k).
    o_ref[...] += jnp.dot(a, w, preferred_element_type=jnp.float32)

    @pl.when(k == pl.num_programs(2) - 1)
    def _():
        y = o_ref[...] + b_ref[...]                       # (tm, tn) + (1, tn)
        # swish(y)/2 = y*sigmoid(y)/2 = 0.25*y*(1 + tanh(0.5*y))   (exact)
        half_swish = 0.25 * y * (1.0 + jnp.tanh(0.5 * y))
        z = jnp.clip(half_swish, -1.0, 1.0)
        o_ref[...] = jnp.tanh(z).astype(o_ref.dtype)


def _pick_tile(dim, max_tile, gran):
    """Largest tile <= max_tile that divides `dim` and is a multiple of `gran`.
    If dim <= max_tile or dim is not a multiple of `gran`, the full extent is
    used (a full-extent block is always a legal shape)."""
    if dim <= max_tile or dim % gran != 0:
        return dim
    t = (max_tile // gran) * gran
    while t >= gran:
        if dim % t == 0:
            return t
        t -= gran
    return dim


def _tile_vmem_bytes(tm, tn, tk, in_itemsize):
    # double-buffered x / w / bias input tiles + double-buffered f32 output tile
    return 2 * (tm * tk + tk * tn + tn) * in_itemsize + 2 * tm * tn * 4


def _auto_tiles(B, N, K, in_itemsize):
    # HBM traffic model: x is re-read (N // tn) times, W is re-read (B // tm)
    # times.  Maximize the tile of the dimension whose operand would otherwise
    # be re-streamed the most (tm when N >= B, tn when B > N).
    if N >= B:
        tm = _pick_tile(B, 1024, 8)
        tn = _pick_tile(N, 512, 128)
    else:
        tm = _pick_tile(B, 512, 8)
        tn = _pick_tile(N, 1024, 128)
    tk = _pick_tile(K, 1024, 128)

    # Shrink (tk first, then the less traffic-critical dim) until the tiles fit
    # the VMEM budget.  Non-divisible full-extent dims may be unshrinkable; the
    # caller falls back to plain XLA in that case rather than OOMing VMEM.
    while _tile_vmem_bytes(tm, tn, tk, in_itemsize) > _VMEM_TILE_BUDGET:
        prev = (tm, tn, tk)
        if tk > 128:
            tk = _pick_tile(K, tk // 2, 128)
        elif N >= B and tn > 128:
            tn = _pick_tile(N, tn // 2, 128)
        elif tm > 8:
            tm = _pick_tile(B, tm // 2, 8)
        elif tn > 128:
            tn = _pick_tile(N, tn // 2, 128)
        if (tm, tn, tk) == prev:
            break
    return tm, tn, tk


def _split_for_megacore(B, N, tm, tn):
    # v7x has 2 TensorCores sharing the "parallel" grid axes: make sure the
    # (i, j) plane has at least 2 blocks whenever the shapes allow it.
    if (B // tm) * (N // tn) >= 2:
        return tm, tn
    if tn > 128:
        new_tn = _pick_tile(N, tn // 2, 128)
        if N // new_tn >= 2:
            return tm, new_tn
    if tm > 8:
        new_tm = _pick_tile(B, tm // 2, 8)
        if B // new_tm >= 2:
            return new_tm, tn
    return tm, tn


def _xla_fallback(x, weight, bias):
    y = jnp.dot(x, weight.T, preferred_element_type=jnp.float32)
    if bias is not None:
        y = y + bias
    return jnp.tanh(jnp.clip(0.5 * y * jax.nn.sigmoid(y), -1.0, 1.0))


def fused_linear_swish(x, weight, bias=None, *, tm=None, tn=None, tk=None,
                       compute_dtype=None,
                       min_flops_for_pallas=64 * 1024 * 1024):
    """x: (B, K), weight: (N, K) in PyTorch nn.Linear layout, bias: (N,) or None."""
    B, K = x.shape
    N, K2 = weight.shape
    assert K == K2, "weight must be (out_features, in_features)"

    # Tiny problems: per-grid-step / launch overhead dominates -> let XLA fuse.
    if 2 * B * K * N < min_flops_for_pallas:
        return _xla_fallback(x, weight, bias)

    itemsize = jnp.dtype(x.dtype).itemsize
    a_tm, a_tn, a_tk = _auto_tiles(B, N, K, itemsize)
    tm = a_tm if tm is None else tm
    tn = a_tn if tn is None else tn
    tk = a_tk if tk is None else tk
    tm, tn = _split_for_megacore(B, N, tm, tn)

    if (B % tm or N % tn or K % tk
            or _tile_vmem_bytes(tm, tn, tk, itemsize) > _VMEM_TILE_BUDGET):
        # Non-divisible / oversized tile configuration: stay on the XLA path
        # rather than risking VMEM OOM or masked partial blocks.
        return _xla_fallback(x, weight, bias)

    grid = (B // tm, N // tn, K // tk)

    # One-time (K, N) layout so the kernel runs the canonical MXU matmul; for a
    # persistent nn.Linear weight this transpose is amortized (or store (K, N)).
    w_t = weight.T
    b2 = (jnp.zeros((N,), jnp.float32) if bias is None
          else bias.astype(jnp.float32)).reshape(1, N)

    cost = pl.CostEstimate(
        flops=2 * B * K * N,
        transcendentals=2 * B * N,                        # tanh + tanh per elem
        bytes_accessed=(x.size * itemsize * (N // tn)     # x re-read per j tile
                        + w_t.size * itemsize * (B // tm)  # W re-read per i tile
                        + b2.size * 4 + B * N * 4))

    kernel = functools.partial(_fused_linear_act_kernel,
                               compute_dtype=compute_dtype)

    return pl.pallas_call(
        kernel,
        out_shape=jax.ShapeDtypeStruct((B, N), jnp.float32),
        grid_spec=pltpu.PrefetchScalarGridSpec(
            num_scalar_prefetch=0,
            grid=grid,
            in_specs=[
                pl.BlockSpec((tm, tk), lambda i, j, k: (i, k)),   # x
                pl.BlockSpec((tk, tn), lambda i, j, k: (k, j)),   # weight (K, N)
                pl.BlockSpec((1, tn), lambda i, j, k: (0, j)),    # bias
            ],
            out_specs=pl.BlockSpec((tm, tn), lambda i, j, k: (i, j)),
        ),
        compiler_params=pltpu.CompilerParams(
            dimension_semantics=("parallel", "parallel", "arbitrary")),
        cost_estimate=cost,
    )(x, w_t, b2)


def reference(x, weight, bias):
    y = jnp.dot(x, weight.T, precision=lax.Precision.HIGHEST) + bias
    z = jnp.clip(y * jax.nn.sigmoid(y) * 0.5, -1.0, 1.0)
    return jnp.tanh(z)


if __name__ == "__main__":
    # Shapes chosen so the tiled Pallas path is exercised with a (2, 2, 2) grid
    # (multi-step K accumulation + parallel (i, j) plane), lane-dense output
    # tiles, and microsecond-scale runtime on any TPU generation.
    batch, in_features, out_features = 256, 512, 512

    key = jax.random.PRNGKey(0)
    kx, kw, kb = jax.random.split(key, 3)

    # Deterministic nn.Linear-style init: U(-1/sqrt(in), 1/sqrt(in))
    bound = 1.0 / jnp.sqrt(jnp.float32(in_features))
    weight = jax.random.uniform(kw, (out_features, in_features), jnp.float32,
                                minval=-bound, maxval=bound)
    bias = jax.random.uniform(kb, (out_features,), jnp.float32,
                              minval=-bound, maxval=bound)
    x = jax.random.normal(kx, (batch, in_features), jnp.float32)

    ref = reference(x, weight, bias)

    # Explicitly tiled path: grid (2, 2, 2).
    out = fused_linear_swish(x, weight, bias, tm=128, tn=256, tk=256)
    out = jax.block_until_ready(out)
    assert out.shape == (batch, out_features)
    err = float(jnp.max(jnp.abs(out - ref)))
    assert jnp.allclose(out, ref, atol=1e-4, rtol=1e-4), f"max abs err {err}"

    # Auto-tiled path (traffic-aware tile selection + megacore split).
    out_auto = jax.block_until_ready(fused_linear_swish(x, weight, bias))
    assert jnp.allclose(out_auto, ref, atol=1e-4, rtol=1e-4)

    # Tiny problem -> XLA fallback branch still matches the module semantics.
    small = jax.block_until_ready(
        fused_linear_swish(x[:8, :64], weight[:128, :64], bias[:128]))
    assert small.shape == (8, 128)

    print("KERNEL_OK")
</pallas_src>

<mosaic_0001>
module attributes {stable_mosaic.version = 11 : i64} {
  func.func @_fused_linear_act_kernel(%arg0: i32, %arg1: i32, %arg2: i32, %arg3: memref<128x256xf32, #tpu.memory_space<vmem>>, %arg4: memref<256x256xf32, #tpu.memory_space<vmem>>, %arg5: memref<1x256xf32, #tpu.memory_space<vmem>>, %arg6: memref<128x256xf32, #tpu.memory_space<vmem>>) attributes {dimension_semantics = [#tpu.dimension_semantics<parallel>, #tpu.dimension_semantics<parallel>, #tpu.dimension_semantics<arbitrary>], iteration_bounds = array<i64: 2, 2, 2>, scalar_prefetch = 0 : i64, scratch_operands = 0 : i64, tpu.core_type = #tpu.core_type<tc>, window_params = [{transform_indices = @transform_0, window_bounds = array<i64: 128, 256>}, {transform_indices = @transform_1, window_bounds = array<i64: 256, 256>}, {transform_indices = @transform_2, window_bounds = array<i64: 1, 256>}, {transform_indices = @transform_3, window_bounds = array<i64: 128, 256>}]} {
    %c0_i32 = arith.constant 0 : i32
    %0 = arith.cmpi eq, %arg2, %c0_i32 : i32
    %1 = arith.extui %0 : i1 to i32
    %c0_i32_0 = arith.constant 0 : i32
    %2 = arith.cmpi ne, %1, %c0_i32_0 : i32
    scf.if %2 {
      %cst_9 = arith.constant 0.000000e+00 : f32
      %12 = vector.broadcast %cst_9 : f32 to vector<128x256xf32>
      %c0_10 = arith.constant 0 : index
      %c0_11 = arith.constant 0 : index
      %13 = vector.load %arg6[%c0_10, %c0_11] : memref<128x256xf32, #tpu.memory_space<vmem>>, vector<128x256xf32>
      tpu.vector_store %arg6[%c0_10, %c0_11], %12 {strides = array<i32>} : memref<128x256xf32, #tpu.memory_space<vmem>>, vector<128x256xf32>,
    } else {
    }
    %c0 = arith.constant 0 : index
    %c0_1 = arith.constant 0 : index
    %3 = vector.load %arg3[%c0, %c0_1] : memref<128x256xf32, #tpu.memory_space<vmem>>, vector<128x256xf32>
    %c0_2 = arith.constant 0 : index
    %c0_3 = arith.constant 0 : index
    %4 = vector.load %arg4[%c0_2, %c0_3] : memref<256x256xf32, #tpu.memory_space<vmem>>, vector<256x256xf32>
    %c0_4 = arith.constant 0 : index
    %c0_5 = arith.constant 0 : index
    %5 = vector.load %arg6[%c0_4, %c0_5] : memref<128x256xf32, #tpu.memory_space<vmem>>, vector<128x256xf32>
    %cst = arith.constant dense<0.000000e+00> : vector<128x256xf32>
    %6 = tpu.matmul %3, %4, %cst {dimension_numbers = #tpu.dot_dimension_numbers<[1], [0], [0], [1], [0, 0, 1, 1], [], []>} : vector<128x256xf32>, vector<256x256xf32>, vector<128x256xf32> -> vector<128x256xf32>
    %7 = arith.addf %5, %6 : vector<128x256xf32>
    %c0_6 = arith.constant 0 : index
    %c0_7 = arith.constant 0 : index
    %8 = vector.load %arg6[%c0_6, %c0_7] : memref<128x256xf32, #tpu.memory_space<vmem>>, vector<128x256xf32>
    tpu.vector_store %arg6[%c0_6, %c0_7], %7 {strides = array<i32>} : memref<128x256xf32, #tpu.memory_space<vmem>>, vector<128x256xf32>,
    %c1_i32 = arith.constant 1 : i32
    %9 = arith.cmpi eq, %arg2, %c1_i32 : i32
    %10 = arith.extui %9 : i1 to i32
    %c0_i32_8 = arith.constant 0 : i32
    %11 = arith.cmpi ne, %10, %c0_i32_8 : i32
    scf.if %11 {
      %c0_9 = arith.constant 0 : index
      %c0_10 = arith.constant 0 : index
      %12 = vector.load %arg6[%c0_9, %c0_10] : memref<128x256xf32, #tpu.memory_space<vmem>>, vector<128x256xf32>
      %c0_11 = arith.constant 0 : index
      %c0_12 = arith.constant 0 : index
      %13 = vector.load %arg5[%c0_11, %c0_12] : memref<1x256xf32, #tpu.memory_space<vmem>>, vector<1x256xf32>
      %14 = vector.broadcast %13 : vector<1x256xf32> to vector<128x256xf32>
      %15 = arith.addf %12, %14 : vector<128x256xf32>
      %cst_13 = arith.constant 2.500000e-01 : f32
      %16 = vector.broadcast %cst_13 : f32 to vector<128x256xf32>
      %17 = arith.mulf %16, %15 : vector<128x256xf32>
      %cst_14 = arith.constant 5.000000e-01 : f32
      %18 = vector.broadcast %cst_14 : f32 to vector<128x256xf32>
      %19 = arith.mulf %18, %15 : vector<128x256xf32>
      %20 = math.tanh %19 : vector<128x256xf32>
      %cst_15 = arith.constant 1.000000e+00 : f32
      %21 = vector.broadcast %cst_15 : f32 to vector<128x256xf32>
      %22 = arith.addf %21, %20 : vector<128x256xf32>
      %23 = arith.mulf %17, %22 : vector<128x256xf32>
      %cst_16 = arith.constant -1.000000e+00 : f32
      %cst_17 = arith.constant 1.000000e+00 : f32
      %24 = vector.broadcast %cst_16 : f32 to vector<128x256xf32>
      %25 = arith.maximumf %24, %23 : vector<128x256xf32>
      %26 = vector.broadcast %cst_17 : f32 to vector<128x256xf32>
      %27 = arith.minimumf %26, %25 : vector<128x256xf32>
      %28 = math.tanh %27 : vector<128x256xf32>
      %c0_18 = arith.constant 0 : index
      %c0_19 = arith.constant 0 : index
      %29 = vector.load %arg6[%c0_18, %c0_19] : memref<128x256xf32, #tpu.memory_space<vmem>>, vector<128x256xf32>
      tpu.vector_store %arg6[%c0_18, %c0_19], %28 {strides = array<i32>} : memref<128x256xf32, #tpu.memory_space<vmem>>, vector<128x256xf32>,
    } else {
    }
    return
  }
  func.func @transform_0(%arg0: i32, %arg1: i32, %arg2: i32) -> (i32, i32) {
    %c0_i32 = arith.constant 0 : i32
    return %arg0, %arg2 : i32, i32
  }
  func.func @transform_1(%arg0: i32, %arg1: i32, %arg2: i32) -> (i32, i32) {
    %c0_i32 = arith.constant 0 : i32
    return %arg2, %arg1 : i32, i32
  }
  func.func @transform_2(%arg0: i32, %arg1: i32, %arg2: i32) -> (i32, i32) {
    %c0_i32 = arith.constant 0 : i32
    %c0_i32_0 = arith.constant 0 : i32
    return %c0_i32, %arg1 : i32, i32
  }
  func.func @transform_3(%arg0: i32, %arg1: i32, %arg2: i32) -> (i32, i32) {
    %c0_i32 = arith.constant 0 : i32
    return %arg0, %arg1 : i32, i32
  }
}

</mosaic_0001>

<bundles_post_ra>
// kernel: tpu_custom_call.1
= control target key start
LH: loop header
LB: loop body
LE: loop exit
PB: predicated region body
PF: predicated region fallthrough
CT: control target
= control target key end

     0   :  { %s2675_s0 = inlined_call_operand.hbm [shape: f32[256,512], index: 0, kind: input, shape index: {}]   ;;  %s2676_s1 = inlined_call_operand.hbm [shape: f32[512,512], index: 1, kind: input, shape index: {}]   ;;  %s2677_s2 = inlined_call_operand.vmem [shape: f32[1,512], index: 2, kind: input, shape index: {}]   ;;  %s2678_s3 = inlined_call_operand.hbm [shape: f32[256,512], index: 3, kind: output, shape index: {}]  }
   0x1   :  { %2695 = sst [smem:[#allocation19_spill]] %s2675_s0 }
   0x2   :  { %2696 = sst [smem:[#allocation20_spill]] %s2677_s2 }
   0x3   :  { %2697 = sst [smem:[#allocation21_spill]] %s2678_s3 }
   0x4   :  { %8 = vsyncpa [#allocation3], 0 }
   0x5   :  { %10 = vsyncpa [#allocation3 + $0x1], 0 }
   0x6   :  { %11 = vsyncpa [#allocation6], 0 }
   0x7   :  { %13 = vsyncpa [#allocation6 + $0x1], 0 }
   0x8   :  { %14 = vsyncpa [#allocation4], 0 }
   0x9   :  { %16 = vsyncpa [#allocation4 + $0x1], 0  ;;  %s1889_s12 = smov 0   ;;  %s1891_s13 = smov 0  }
   0xa   :  { %s1893_s14 = smov 0   ;;  %s1895_s15 = smov 0  }
   0xb   :  { %s1897_s16 = smov 0   ;;  %s1899_s17 = smov 0  }
   0xc   :  { %s1901_s18 = smov 0   ;;  %s1903_s19 = smov 0  }
   0xd   :  { %s1905_s20 = smov 0   ;;  %s1907_s21 = smov 0  }
   0xe   :  { %s1909_s22 = smov 0   ;;  %s1911_s23 = smov 0  }
   0xf   :  { %s1913_s24 = smov 0   ;;  %s1915_s25 = smov 0  }
  0x10   :  { %s1917_s26 = smov 0   ;;  %s1919_s27 = smov 0  }
  0x11 LB: > { %2698 = sst [smem:[#allocation11_spill]] %s1833_s21  ;;  %s1190_s28 = sadd.s32 4294967295, %s1857_s27   ;;  %s1857_s27 = sphi %s1919_s27, %s22_s27   ;;  %s1853_s26 = sphi %s1917_s26, %s2745_s26   ;;  %s1849_s25 = sphi %s1915_s25, %s2758_s25   ;;  %s1845_s24 = sphi %s1913_s24, %s2757_s24   ;;  %s1841_s23 = sphi %s1911_s23, %s2742_s23   ;;  %s1837_s22 = sphi %s1909_s22, %s2756_s22   ;;  %s1833_s21 = sphi %s1907_s21, %s2755_s21   ;;  %s1829_s20 = sphi %s1905_s20, %s2754_s20   ;;  %s1825_s19 = sphi %s1903_s19, %s2753_s19   ;;  %s1821_s18 = sphi %s1901_s18, %s2752_s18   ;;  %s1817_s17 = sphi %s1899_s17, %s2751_s17   ;;  %s1813_s16 = sphi %s1897_s16, %s2750_s16   ;;  %s1809_s15 = sphi %s1895_s15, %s2749_s15   ;;  %s1805_s14 = sphi %s1893_s14, %s2748_s14   ;;  %s1801_s13 = sphi %s1891_s13, %s2747_s13   ;;  %s1797_s12 = sphi %s1889_s12, %s2746_s12  }
  0x12   : > { %2699 = sst [smem:[#allocation12_spill]] %s1837_s22  ;;  %s34_s29 = sadd.s32 1, %s1845_s24 }
  0x13   : > { %2700 = sst [smem:[#allocation13_spill]] %s1841_s23  ;;  %p1969_p0 = scmp.ge.s32.totalorder %s34_s29, 2 }
  0x14   : > { %2701 = sst [smem:[#allocation14_spill]] %s1853_s26  ;;  %p57_p1 = scmp.ne.s32.totalorder %s1829_s20, %s1825_s19 }
  0x15   : > { %s2760_s29 = smov (%p1969_p0, %s34_s29), 0  ;;  %p2684_p2 = scmp.eq.s32.totalorder %s1857_s27, 0 }
  0x16   : > { %2703 = sst [smem:[#allocation15_spill]] %s2760_s29  ;;  %p63_p3 = scmp.ne.s32.totalorder %s1825_s19, %s1821_s18 }
  0x17   : > { %s1985_s6 = ssub.s32 %s1845_s24, %s2760_s29  ;;  %p1987_p4 = scmp.eq.s32.totalorder %s1190_s28, 0 }
  0x18   : > { %p1993_p5 = por %p2684_p2, %p57_p1  ;;  %p1997_p6 = scmp.eq.s32.totalorder %s1190_s28, 7 }
  0x19   : > { %s2704_s7 = scalar_select %p1987_p4, 1, 0 }
  0x1a   : > { %s2706_s9 = scalar_select %p1997_p6, 1, 0 }
  0x1b   : > { %p2003_p7 = por %p1987_p4, %p63_p3  ;;  %p2683_p8 = scmp.lt.s32.totalorder %s1857_s27, 8 }
  0x1c   : > { %s169_s11 = sand.u32 1, %s1829_s20   ;;  %s1196_s5 = sshll.u32 %s1845_s24, 1 }
  0x1d   : > { %s2707_s10 = scalar_select %p2003_p7, 1, 0 }
  0x1e   : > { %s1194_s18 = sshll.u32 %s169_s11, 8  ;;  %s1250_s4 = sshll.u32 %s1853_s26, 6 }
  0x1f   : > { %2708 = sst [smem:[#allocation16_spill]] %s2707_s10  ;;  %s173_s29 = scalar_lea.vmem [#allocation2], %s1194_s18 }
  0x20   : > { %s183_s3 = sshll.u32 %s173_s29, 4  ;;  %s180_s23 = sadd.s32 %s1250_s4, %s1196_s5  ;;  %s2011_s3 = int_to_ptr.vmem [resolvable:$true] %s183_s3 }
  0x21   : > { %s1198_s21 = sshll.u32 %s180_s23, 7  ;;  %p2017_p9 = pnand %p2683_p8, %p1993_p5 }
  0x22   : > { %s2710_s0 = sld [smem:[#allocation19_spill]]  ;;  %s2027_s29 = scalar_lea.sflag [#allocation3], %s169_s11 }
  0x23   : > { %p1633_p12 = pneg %p2017_p9 }
  0x28   : > { %s2024_s10 = scalar_lea.hbm %s2710_s0, %s1198_s21  ;;  %s1636_s21 = scalar_lea.hbm %s2710_s0, 16384 }
  0x29   : > { %s1631_s23 = scalar_lea.hbm %s2024_s10, 4096  ;;  %p1637_p3 = scmp.lt.u32.totalorder %s2024_s10, %s2710_s0 }
  0x2a   : > { %p1632_p11 = scmp.ne.s32.totalorder %s2024_s10, %s1631_s23  ;;  %p1638_p5 = scmp.lt.u32.totalorder %s1636_s21, %s1631_s23 }
  0x2b   : > { %p1640_p2 = scmp.lt.u32.totalorder %s1631_s23, %s2024_s10 }
  0x2c   : > { %p1634_p13 = pnand %p1633_p12, %p1632_p11  ;;  %p1639_p8 = por %p1638_p5, %p1637_p3 }
  0x2e   : > { %p1635_p1 = pneg %p1634_p13  ;;  %p1641_p10 = por %p1640_p2, %p1639_p8 }
  0x30   : > { %p1642_p7 = pnand %p1641_p10, %p1635_p1 }
  0x32   : > { %1645 = shalt.err (!%p1642_p7)
}
  0x33   : > { %s1646_s8 = scalar_lea.vmem %s2011_s3, 4096  ;;  %s1859_s11 = smov [#allocation2]  }
  0x34   : > { %p1647_p11 = scmp.ne.s32.totalorder %s2011_s3, %s1646_s8  ;;  %s1651_s18 = sshll.u32 %s1859_s11, 4  ;;  %s1652_s18 = int_to_ptr.vmem [resolvable:$false] %s1651_s18 }
  0x35   : > { %s1653_s2 = scalar_lea.vmem %s1652_s18, 8192  ;;  %p1654_p4 = scmp.lt.s32.totalorder %s2011_s3, %s1652_s18 }
  0x36   : > { %p1649_p13 = pnand %p1647_p11, %p1633_p12  ;;  %p1655_p3 = scmp.lt.s32.totalorder %s1653_s2, %s1646_s8 }
  0x38   : > { %p1650_p6 = pneg %p1649_p13  ;;  %p1656_p5 = por %p1655_p3, %p1654_p4 }
  0x3a   : > { %p1657_p2 = pnand %p1656_p5, %p1650_p6 }
  0x3c   : > { %1660 = shalt.err (!%p1657_p2)
}
  0x3d   : > { %s2687_s23 = smov 512   ;;  %s2688_s22 = smov 256  }
  0x3e   : > { %s2689_s21 = smov 16   ;;  %p223_p4 = scmp.lt.s32.totalorder %s1857_s27, 9 }
  0x3f   : > { %1358 = dma.hbm_to_vmem [thread:$0]  (!%p2017_p9), %s2024_s10, 4096, %s2011_s3, %s2027_s29, %s2687_s23, %s2688_s22, %s2689_s21  }
  0x40   : > { %p2711_p6 = scmp.ge.s32.totalorder %s1857_s27, 1  ;;  %s1191_s5 = sadd.s32 4294967294, %s1857_s27  }
  0x41   : > { %s37_s8 = sadd.s32 1, %s1849_s25  ;;  %s78_s28 = sadd.s32 1, %s1817_s17 }
  0x42   : > { %p2061_p7 = pnand %p2711_p6, %p223_p4  ;;  %s2762_s8 = smov (!%p1969_p0, %s37_s8), %s1849_s25 }
  0x43   : > { %p85_p8 = scmp.ne.s32.totalorder %s1817_s17, %s1813_s16  ;;  %p39_p10 = scmp.ge.s32.totalorder %s2762_s8, 2 }
  0x44   : > { %p91_p9 = scmp.ne.s32.totalorder %s1813_s16, %s1809_s15  ;;  %p2713_p12 = scmp.eq.s32.totalorder %s1857_s27, 0 }
  0x45   : > { %s132_s10 = sadd.s32 1, %s1805_s14  ;;  %s2764_s8 = smov (%p39_p10, %s2762_s8), 0 }
  0x46   : > { %p2077_p1 = por %p85_p8, %p2713_p12  ;;  %2715 = sst [smem:[#allocation17_spill]] %s2764_s8 }
  0x47   : > { %s2716_s29 = sadd.s32 1, %s1853_s26  ;;  %s74_s30 = ssub.s32 %s1849_s25, %s2764_s8 }
  0x48   : > { %s2766_s29 = smov (!%p39_p10, %s2716_s29), %s1853_s26  ;;  %p2717_p0 = scmp.ne.s32.totalorder %s2704_s7, 0 }
  0x49   : > { %p43_p13 = scmp.ge.s32.totalorder %s2766_s29, 2  ;;  %s75_s15 = sor.u32 %s74_s30, %s1985_s6 }
  0x4a   : > { %p2091_p11 = por %p91_p9, %p2717_p0  ;;  %p76_p3 = scmp.eq.s32.totalorder %s75_s15, 0 }
  0x4b   : > { %p142_p5 = scmp.ne.s32.totalorder %s1805_s14, %s1801_s13  ;;  %s2768_s29 = smov (%p43_p13, %s2766_s29), 0 }
  0x4c   : > { %s2718_s11 = scalar_select %p2091_p11, 1, 0 }
  0x4d   : > { %2719 = sst [smem:[#allocation18_spill]] %s2768_s29  ;;  %s45_s7 = ssub.s32 %s1853_s26, %s2768_s29 }
  0x4e   : > { %s2101_s18 = scalar_select %p76_p3, %s1817_s17, %s78_s28  }
  0x4f   : > { %p2720_p2 = scmp.ne.s32.totalorder %s2706_s9, 0  ;;  %s47_s23 = sor.u32 %s1985_s6, %s45_s7 }
  0x50   : > { %s129_s22 = sor.u32 %s74_s30, %s45_s7  ;;  %p48_p6 = scmp.eq.s32.totalorder %s47_s23, 0 }
  0x51   : > { %p2107_p4 = por %p2720_p2, %p142_p5  ;;  %p130_p8 = scmp.eq.s32.totalorder %s129_s22, 0 }
  0x52   : > { %p148_p10 = scmp.ne.s32.totalorder %s1801_s13, %s1797_s12  ;;  %p149_p9 = scmp.eq.s32.totalorder %s1191_s5, 7 }
  0x53   : > { %s2721_s2 = scalar_select %p2107_p4, 1, 0 }
  0x54   : > { %s2722_s15 = sadd.s32 1, %s1829_s20  ;;  %p2122_p12 = por %p149_p9, %p148_p10 }
  0x55   : > { %s2117_s21 = scalar_select %p48_p6, %s1829_s20, %s2722_s15  }
  0x56   : > { %s2120_s0 = scalar_select %p130_p8, %s1805_s14, %s132_s10  }
  0x57   : > { %s2723_s28 = scalar_select %p2122_p12, 1, 0 }
  0x58   : > { %s193_s9 = sand.u32 1, %s1817_s17   ;;  %s1201_s8 = sshll.u32 %s1849_s25, 1 }
  0x59   : > { %s1199_s29 = sshll.u32 %s193_s9, 9  ;;  %s1251_s6 = sshll.u32 %s1845_s24, 7 }
  0x5a   : > { %s197_s30 = scalar_lea.vmem [#allocation5], %s1199_s29  ;;  %s204_s7 = sadd.s32 %s1251_s6, %s1201_s8 }
  0x5b   : > { %s207_s23 = sshll.u32 %s197_s30, 4  ;;  %s1203_s22 = sshll.u32 %s204_s7, 7  ;;  %s2129_s23 = int_to_ptr.vmem [resolvable:$true] %s207_s23 }
  0x5c   : > { %p2724_p0 = scmp.lt.s32.totalorder %s1857_s27, 8  ;;  %s2142_s26 = scalar_lea.hbm %s2676_s1, %s1203_s22 }
  0x5d   : > { %s2144_s8 = scalar_lea.sflag [#allocation6], %s193_s9  ;;  %s1661_s29 = scalar_lea.hbm %s2142_s26, 8192 }
  0x5e   : > { %p2135_p13 = pnand %p2724_p0, %p2077_p1  ;;  %p1662_p3 = scmp.ne.s32.totalorder %s2142_s26, %s1661_s29 }
  0x5f   : > { %s1666_s30 = scalar_lea.hbm %s2676_s1, 32768  ;;  %p1667_p6 = scmp.lt.u32.totalorder %s2142_s26, %s2676_s1 }
  0x60   : > { %p1663_p1 = pneg %p2135_p13  ;;  %p1668_p8 = scmp.lt.u32.totalorder %s1666_s30, %s1661_s29 }
  0x61   : > { %p1670_p9 = scmp.lt.u32.totalorder %s1661_s29, %s2142_s26 }
  0x62   : > { %p1664_p5 = pnand %p1663_p1, %p1662_p3  ;;  %p1669_p10 = por %p1668_p8, %p1667_p6 }
  0x64   : > { %p1665_p2 = pneg %p1664_p5  ;;  %p1671_p0 = por %p1670_p9, %p1669_p10 }
  0x66   : > { %p1672_p12 = pnand %p1671_p0, %p1665_p2 }
  0x68   : > { %1675 = shalt.err (!%p1672_p12)
}
  0x69   : > { %s1676_s9 = scalar_lea.vmem %s2129_s23, 8192  ;;  %s1863_s10 = smov [#allocation5]  }
  0x6a   : > { %p1677_p3 = scmp.ne.s32.totalorder %s2129_s23, %s1676_s9  ;;  %s1681_s15 = sshll.u32 %s1863_s10, 4  ;;  %s1682_s15 = int_to_ptr.vmem [resolvable:$false] %s1681_s15 }
  0x6b   : > { %s1683_s3 = scalar_lea.vmem %s1682_s15, 16384  ;;  %p1684_p11 = scmp.lt.s32.totalorder %s2129_s23, %s1682_s15 }
  0x6c   : > { %p1679_p5 = pnand %p1677_p3, %p1663_p1  ;;  %p1685_p6 = scmp.lt.s32.totalorder %s1683_s3, %s1676_s9 }
  0x6e   : > { %p1680_p4 = pneg %p1679_p5  ;;  %p1686_p8 = por %p1685_p6, %p1684_p11 }
  0x70   : > { %p1687_p10 = pnand %p1686_p8, %p1680_p4 }
  0x72   : > { %1690 = shalt.err (!%p1687_p10)
}
  0x73   : > { %s2726_s29 = smov 16   ;;  %s2727_s6 = smov 256  }
  0x74   : > { %s2728_s30 = smov 512   ;;  %227 = sbr.rel (%p2061_p7) target bundleno = 574 (0x23e), region = 32 }
  0x75   : > { %1361 = dma.hbm_to_vmem [thread:$0]  (!%p2135_p13), %s2142_s26, 8192, %s2129_s23, %s2144_s8, %s2728_s30, %s2727_s6, %s2726_s29  }
  0x76   : > { %s2729_s7 = sld [smem:[#allocation16_spill]] (!%p2061_p7)  ;;  %s229_s22 = sand.u32 (!%p2061_p7), 1, %s1825_s19  }
  0x77   : > { %s1205_s10 = sshll.u32 (!%p2061_p7), %s229_s22, 8  ;;  %s230_s9 = scalar_lea.sflag (!%p2061_p7), [#allocation3], %s229_s22 }
  0x78   : > { %s2178_s15 = scalar_lea.vmem (!%p2061_p7), [#allocation2], %s1205_s10 }
  0x7c   : > { %p2730_p11 = scmp.ne.s32.totalorder %s2729_s7, 0 }
  0x7e   : > { %1784 = dma.done.wait (%p2730_p11), %s230_s9, 4096  }
  0x7f   : > { %1786 = vsyncadd (%p2730_p11), %s230_s9, 4294963200  ;;  %s238_s5 = sand.u32 1, %s1813_s16   ;;  %p2731_p7 = scmp.ne.s32.totalorder %s2718_s11, 0 }
  0x80   : > { %s1206_s3 = sshll.u32 %s238_s5, 9  ;;  %s239_s26 = scalar_lea.sflag [#allocation6], %s238_s5 }
  0x81   : > { %s2185_s23 = scalar_lea.vmem [#allocation5], %s1206_s3 }
  0x82   : > { %1788 = dma.done.wait (%p2731_p7), %s239_s26, 8192  }
  0x83   : > { %1790 = vsyncadd (%p2731_p7), %s239_s26, 4294959104  ;;  %s2732_s4 = sld [smem:[#allocation12_spill]]  ;;  %s271_s8 = sand.u32 1, %s1801_s13  }
  0x84   : > { %s1207_s6 = sshll.u32 %s271_s8, 8  ;;  %s2733_s10 = sld [smem:[#allocation20_spill]] }
  0x85   : > { %s2205_s11 = scalar_lea.vmem [#allocation7], %s1207_s6  ;;  %s2734_s5 = sld [smem:[#allocation11_spill]] }
  0x89   : > { %s2193_s29 = sshll.u32 %s2732_s4, 1 }
  0x8a   : > { %p279_p4 = scmp.lt.s32.totalorder %s2193_s29, 3 }
  0x8b   : > { %p1209_p12 = scmp.ne.s32.totalorder %s2734_s5, 0 }
  0x8c   : > { %s2199_s30 = scalar_select %p279_p4, %s2193_s29, 3 }
  0x8d   : > { %288 = sbr.rel (%p1209_p12) target bundleno = 158 (0x9e), region = 44  ;;  %v1864_v0 = vmov (!%p1209_p12), 0.0  }
  0x8e   : > { %s281_s9 = scalar_lea.vmem %s2733_s10, %s2199_s30  ;;  %289 = vst [vmem:[%s2205_s11] sm:$0xff] (!%p1209_p12), %v1864_v0  ;;  %290 = vst [vmem:[%s2205_s11 + $0x8] sm:$0xff] (!%p1209_p12), %v1864_v0 }
  0x8f   : > { %291 = vst [vmem:[%s2205_s11 + $0x10] sm:$0xff] (!%p1209_p12), %v1864_v0  ;;  %292 = vst [vmem:[%s2205_s11 + $0x18] sm:$0xff] (!%p1209_p12), %v1864_v0 }
  0x90   : > { %293 = vst [vmem:[%s2205_s11 + $0x20] sm:$0xff] (!%p1209_p12), %v1864_v0  ;;  %294 = vst [vmem:[%s2205_s11 + $0x28] sm:$0xff] (!%p1209_p12), %v1864_v0 }
  0x91   : > { %295 = vst [vmem:[%s2205_s11 + $0x30] sm:$0xff] (!%p1209_p12), %v1864_v0  ;;  %296 = vst [vmem:[%s2205_s11 + $0x38] sm:$0xff] (!%p1209_p12), %v1864_v0 }
  0x92   : > { %297 = vst [vmem:[%s2205_s11 + $0x40] sm:$0xff] (!%p1209_p12), %v1864_v0  ;;  %298 = vst [vmem:[%s2205_s11 + $0x48] sm:$0xff] (!%p1209_p12), %v1864_v0 }
  0x93   : > { %299 = vst [vmem:[%s2205_s11 + $0x50] sm:$0xff] (!%p1209_p12), %v1864_v0  ;;  %300 = vst [vmem:[%s2205_s11 + $0x58] sm:$0xff] (!%p1209_p12), %v1864_v0 }
  0x94   : > { %301 = vst [vmem:[%s2205_s11 + $0x60] sm:$0xff] %v1864_v0  ;;  %302 = vst [vmem:[%s2205_s11 + $0x68] sm:$0xff] %v1864_v0 }
  0x95   : > { %303 = vst [vmem:[%s2205_s11 + $0x70] sm:$0xff] %v1864_v0  ;;  %304 = vst [vmem:[%s2205_s11 + $0x78] sm:$0xff] %v1864_v0 }
  0x96   : > { %305 = vst [vmem:[%s2205_s11 + $0x80] sm:$0xff] %v1864_v0  ;;  %306 = vst [vmem:[%s2205_s11 + $0x88] sm:$0xff] %v1864_v0 }
  0x97   : > { %307 = vst [vmem:[%s2205_s11 + $0x90] sm:$0xff] %v1864_v0  ;;  %308 = vst [vmem:[%s2205_s11 + $0x98] sm:$0xff] %v1864_v0 }
  0x98   : > { %309 = vst [vmem:[%s2205_s11 + $0xa0] sm:$0xff] %v1864_v0  ;;  %310 = vst [vmem:[%s2205_s11 + $0xa8] sm:$0xff] %v1864_v0 }
  0x99   : > { %311 = vst [vmem:[%s2205_s11 + $0xb0] sm:$0xff] %v1864_v0  ;;  %312 = vst [vmem:[%s2205_s11 + $0xb8] sm:$0xff] %v1864_v0 }
  0x9a   : > { %313 = vst [vmem:[%s2205_s11 + $0xc0] sm:$0xff] %v1864_v0  ;;  %314 = vst [vmem:[%s2205_s11 + $0xc8] sm:$0xff] %v1864_v0 }
  0x9b   : > { %315 = vst [vmem:[%s2205_s11 + $0xd0] sm:$0xff] %v1864_v0  ;;  %316 = vst [vmem:[%s2205_s11 + $0xd8] sm:$0xff] %v1864_v0 }
  0x9c   : > { %317 = vst [vmem:[%s2205_s11 + $0xe0] sm:$0xff] %v1864_v0  ;;  %318 = vst [vmem:[%s2205_s11 + $0xe8] sm:$0xff] %v1864_v0 }
  0x9d   : > { %319 = vst [vmem:[%s2205_s11 + $0xf0] sm:$0xff] %v1864_v0  ;;  %320 = vst [vmem:[%s2205_s11 + $0xf8] sm:$0xff] %v1864_v0 }
  0x9e PF: > { %v354_v1 = vld [vmem:[%s2185_s23 + $0x8] sm:$0xff]  ;;  %v356_v2 = vld [vmem:[%s2185_s23 + $0x18] sm:$0xff]  ;;  %v353_v3 = vld [vmem:[%s2185_s23] sm:$0xff] }
  0x9f   : > { %v1253_v4 = vpack.c.bf16 %v356_v2, %v354_v1  ;;  %v355_v5 = vld [vmem:[%s2185_s23 + $0x10] sm:$0xff]  ;;  %v358_v6 = vld [vmem:[%s2185_s23 + $0x28] sm:$0xff]  ;;  %v360_v7 = vld [vmem:[%s2185_s23 + $0x38] sm:$0xff] }
  0xa0   : > { %v1255_v8 = vpack.c.bf16 %v355_v5, %v353_v3  ;;  %v1257_v9 = vpack.c.bf16 %v360_v7, %v358_v6  ;;  %v357_v10 = vld [vmem:[%s2185_s23 + $0x20] sm:$0xff]  ;;  %v359_v11 = vld [vmem:[%s2185_s23 + $0x30] sm:$0xff]  ;;  %v362_v12 = vld [vmem:[%s2185_s23 + $0x48] sm:$0xff] }
  0xa1   : > { %1254 = vmatprep.subr.bf16.mxu0 %v1253_v4  ;;  %1317 = vmatprep.subr.bf16.mxu1 %v1253_v4  ;;  %v364_v13 = vld [vmem:[%s2185_s23 + $0x58] sm:$0xff]  ;;  %v1259_v14 = vpack.c.bf16 %v359_v11, %v357_v10  ;;  %v361_v16 = vld [vmem:[%s2185_s23 + $0x40] sm:$0xff]  ;;  %v363_v17 = vld [vmem:[%s2185_s23 + $0x50] sm:$0xff] }
  0xa2   : > { %1256 = vmatpush1.bf16.msra.mxu0 %v1255_v8  ;;  %1333 = vmatpush1.bf16.msra.mxu1 %v1255_v8  ;;  %v1261_v15 = vpack.c.bf16 %v364_v13, %v362_v12  ;;  %v366_v18 = vld [vmem:[%s2185_s23 + $0x68] sm:$0xff]  ;;  %v368_v19 = vld [vmem:[%s2185_s23 + $0x78] sm:$0xff]  ;;  %v1263_v20 = vpack.c.bf16 %v363_v17, %v361_v16  ;;  %v365_v22 = vld [vmem:[%s2185_s23 + $0x60] sm:$0xff] }
  0xa3   : > { %1258 = vmatprep.subr.bf16.mxu0 %v1257_v9  ;;  %1318 = vmatprep.subr.bf16.mxu1 %v1257_v9  ;;  %v1265_v21 = vpack.c.bf16 %v368_v19, %v366_v18  ;;  %v367_v23 = vld [vmem:[%s2185_s23 + $0x70] sm:$0xff]  ;;  %v370_v24 = vld [vmem:[%s2185_s23 + $0x88] sm:$0xff]  ;;  %v372_v25 = vld [vmem:[%s2185_s23 + $0x98] sm:$0xff] }
  0xa4   : > { %v1267_v26 = vpack.c.bf16 %v367_v23, %v365_v22  ;;  %v1269_v27 = vpack.c.bf16 %v372_v25, %v370_v24  ;;  %v369_v28 = vld [vmem:[%s2185_s23 + $0x80] sm:$0xff]  ;;  %v371_v29 = vld [vmem:[%s2185_s23 + $0x90] sm:$0xff]  ;;  %v374_v30 = vld [vmem:[%s2185_s23 + $0xa8] sm:$0xff] }
  0xa5   : > { %v376_v31 = vld [vmem:[%s2185_s23 + $0xb8] sm:$0xff]  ;;  %v1271_v32 = vpack.c.bf16 %v371_v29, %v369_v28  ;;  %v373_v34 = vld [vmem:[%s2185_s23 + $0xa0] sm:$0xff]  ;;  %v375_v35 = vld [vmem:[%s2185_s23 + $0xb0] sm:$0xff] }
  0xa6   : > { %1260 = vmatpush1.bf16.msra.mxu0 %v1259_v14  ;;  %1334 = vmatpush1.bf16.msra.mxu1 %v1259_v14  ;;  %v1273_v33 = vpack.c.bf16 %v376_v31, %v374_v30  ;;  %v378_v36 = vld [vmem:[%s2185_s23 + $0xc8] sm:$0xff]  ;;  %v380_v37 = vld [vmem:[%s2185_s23 + $0xd8] sm:$0xff]  ;;  %v1275_v38 = vpack.c.bf16 %v375_v35, %v373_v34  ;;  %v377_v39 = vld [vmem:[%s2185_s23 + $0xc0] sm:$0xff] }
  0xa7   : > { %1262 = vmatprep.subr.bf16.mxu0 %v1261_v15  ;;  %1319 = vmatprep.subr.bf16.mxu1 %v1261_v15  ;;  %v1277_v40 = vpack.c.bf16 %v380_v37, %v378_v36  ;;  %v379_v41 = vld [vmem:[%s2185_s23 + $0xd0] sm:$0xff]  ;;  %v322_v42 = vld [vmem:[%s2178_s15 + $0x8] sm:$0xff]  ;;  %v384_v45 = vld [vmem:[%s2185_s23 + $0xf8] sm:$0xff] }
  0xa8   : > { %v338_v43 = vld [vmem:[%s2178_s15 + $0x88] sm:$0xff]  ;;  %513 = vmatprep.mubr.f32.mxu0 %v322_v42  ;;  %v1279_v46 = vpack.c.bf16 %v379_v41, %v377_v39  ;;  %v381_v48 = vld [vmem:[%s2185_s23 + $0xe0] sm:$0xff]  ;;  %v383_v49 = vld [vmem:[%s2185_s23 + $0xf0] sm:$0xff] }
  0xa9   : > { %v382_v44 = vld [vmem:[%s2185_s23 + $0xe8] sm:$0xff]  ;;  %561 = vmatprep.mubr.f32.mxu1 %v338_v43  ;;  %v388_v51 = vld [vmem:[%s2185_s23 + $0x118] sm:$0xff]  ;;  %v1283_v52 = vpack.c.bf16 %v383_v49, %v381_v48  ;;  %v385_v54 = vld [vmem:[%s2185_s23 + $0x100] sm:$0xff] }
  0xaa   : > { %1264 = vmatpush1.bf16.msra.mxu0 %v1263_v20  ;;  %1335 = vmatpush1.bf16.msra.mxu1 %v1263_v20  ;;  %v1281_v47 = vpack.c.bf16 %v384_v45, %v382_v44  ;;  %v386_v50 = vld [vmem:[%s2185_s23 + $0x108] sm:$0xff]  ;;  %v387_v55 = vld [vmem:[%s2185_s23 + $0x110] sm:$0xff]  ;;  %v392_v57 = vld [vmem:[%s2185_s23 + $0x138] sm:$0xff] }
  0xab   : > { %1266 = vmatprep.subr.bf16.mxu0 %v1265_v21  ;;  %1320 = vmatprep.subr.bf16.mxu1 %v1265_v21  ;;  %v1285_v53 = vpack.c.bf16 %v388_v51, %v386_v50  ;;  %v390_v56 = vld [vmem:[%s2185_s23 + $0x128] sm:$0xff]  ;;  %v1287_v58 = vpack.c.bf16 %v387_v55, %v385_v54  ;;  %v389_v60 = vld [vmem:[%s2185_s23 + $0x120] sm:$0xff]  ;;  %v391_v61 = vld [vmem:[%s2185_s23 + $0x130] sm:$0xff] }
  0xac   : > { %v1289_v59 = vpack.c.bf16 %v392_v57, %v390_v56  ;;  %v394_v62 = vld [vmem:[%s2185_s23 + $0x148] sm:$0xff]  ;;  %v396_v63 = vld [vmem:[%s2185_s23 + $0x158] sm:$0xff]  ;;  %v1291_v0 = vpack.c.bf16 %v391_v61, %v389_v60  ;;  %v393_v2 = vld [vmem:[%s2185_s23 + $0x140] sm:$0xff] }
  0xad   : > { %v1293_v1 = vpack.c.bf16 %v396_v63, %v394_v62  ;;  %v395_v3 = vld [vmem:[%s2185_s23 + $0x150] sm:$0xff]  ;;  %v398_v4 = vld [vmem:[%s2185_s23 + $0x168] sm:$0xff]  ;;  %v400_v5 = vld [vmem:[%s2185_s23 + $0x178] sm:$0xff] }
  0xae   : > { %1268 = vmatpush1.bf16.msra.mxu0 %v1267_v26  ;;  %1336 = vmatpush1.bf16.msra.mxu1 %v1267_v26  ;;  %v1295_v6 = vpack.c.bf16 %v395_v3, %v393_v2  ;;  %v1297_v7 = vpack.c.bf16 %v400_v5, %v398_v4  ;;  %v397_v8 = vld [vmem:[%s2185_s23 + $0x160] sm:$0xff]  ;;  %v399_v9 = vld [vmem:[%s2185_s23 + $0x170] sm:$0xff]  ;;  %v402_v10 = vld [vmem:[%s2185_s23 + $0x188] sm:$0xff] }
  0xaf   : > { %1270 = vmatprep.subr.bf16.mxu0 %v1269_v27  ;;  %1321 = vmatprep.subr.bf16.mxu1 %v1269_v27  ;;  %v404_v11 = vld [vmem:[%s2185_s23 + $0x198] sm:$0xff]  ;;  %v1299_v12 = vpack.c.bf16 %v399_v9, %v397_v8  ;;  %v401_v14 = vld [vmem:[%s2185_s23 + $0x180] sm:$0xff]  ;;  %v403_v15 = vld [vmem:[%s2185_s23 + $0x190] sm:$0xff] }
  0xb0   : > { %v1301_v13 = vpack.c.bf16 %v404_v11, %v402_v10  ;;  %v406_v16 = vld [vmem:[%s2185_s23 + $0x1a8] sm:$0xff]  ;;  %v408_v17 = vld [vmem:[%s2185_s23 + $0x1b8] sm:$0xff]  ;;  %v1303_v18 = vpack.c.bf16 %v403_v15, %v401_v14  ;;  %v405_v20 = vld [vmem:[%s2185_s23 + $0x1a0] sm:$0xff] }
  0xb1   : > { %v1305_v19 = vpack.c.bf16 %v408_v17, %v406_v16  ;;  %v407_v21 = vld [vmem:[%s2185_s23 + $0x1b0] sm:$0xff]  ;;  %v410_v22 = vld [vmem:[%s2185_s23 + $0x1c8] sm:$0xff]  ;;  %v412_v23 = vld [vmem:[%s2185_s23 + $0x1d8] sm:$0xff] }
  0xb2   : > { %1272 = vmatpush1.bf16.msra.mxu0 %v1271_v32  ;;  %1337 = vmatpush1.bf16.msra.mxu1 %v1271_v32  ;;  %v1307_v24 = vpack.c.bf16 %v407_v21, %v405_v20  ;;  %v1309_v25 = vpack.c.bf16 %v412_v23, %v410_v22  ;;  %v409_v26 = vld [vmem:[%s2185_s23 + $0x1c0] sm:$0xff]  ;;  %v411_v27 = vld [vmem:[%s2185_s23 + $0x1d0] sm:$0xff]  ;;  %v414_v28 = vld [vmem:[%s2185_s23 + $0x1e8] sm:$0xff] }
  0xb3   : > { %1274 = vmatprep.subr.bf16.mxu0 %v1273_v33  ;;  %1322 = vmatprep.subr.bf16.mxu1 %v1273_v33  ;;  %v416_v29 = vld [vmem:[%s2185_s23 + $0x1f8] sm:$0xff]  ;;  %v1311_v30 = vpack.c.bf16 %v411_v27, %v409_v26  ;;  %v413_v32 = vld [vmem:[%s2185_s23 + $0x1e0] sm:$0xff]  ;;  %v415_v33 = vld [vmem:[%s2185_s23 + $0x1f0] sm:$0xff] }
  0xb4   : > { %v1313_v31 = vpack.c.bf16 %v416_v29, %v414_v28  ;;  %v1315_v34 = vpack.c.bf16 %v415_v33, %v413_v32  ;;  %v321_v35 = vld [vmem:[%s2178_s15] sm:$0xff]  ;;  %v324_v37 = vld [vmem:[%s2178_s15 + $0x18] sm:$0xff]  ;;  %v323_v39 = vld [vmem:[%s2178_s15 + $0x10] sm:$0xff] }
  0xb5   : > { %v337_v36 = vld [vmem:[%s2178_s15 + $0x80] sm:$0xff]  ;;  %v326_v41 = vld [vmem:[%s2178_s15 + $0x28] sm:$0xff]  ;;  %v328_v45 = vld [vmem:[%s2178_s15 + $0x38] sm:$0xff] }
  0xb6   : > { %1276 = vmatpush1.bf16.msra.mxu0 %v1275_v38  ;;  %1338 = vmatpush1.bf16.msra.mxu1 %v1275_v38  ;;  %v340_v38 = vld [vmem:[%s2178_s15 + $0x98] sm:$0xff]  ;;  %v342_v42 = vld [vmem:[%s2178_s15 + $0xa8] sm:$0xff]  ;;  %v325_v43 = vld [vmem:[%s2178_s15 + $0x20] sm:$0xff] }
  0xb7   : > { %1278 = vmatprep.subr.bf16.mxu0 %v1277_v40  ;;  %1323 = vmatprep.subr.bf16.mxu1 %v1277_v40  ;;  %v339_v40 = vld [vmem:[%s2178_s15 + $0x90] sm:$0xff]  ;;  %v341_v44 = vld [vmem:[%s2178_s15 + $0xa0] sm:$0xff]  ;;  %v330_v49 = vld [vmem:[%s2178_s15 + $0x48] sm:$0xff] }
  0xb8   : > { %v343_v48 = vld [vmem:[%s2178_s15 + $0xb0] sm:$0xff]  ;;  %v346_v50 = vld [vmem:[%s2178_s15 + $0xc8] sm:$0xff]  ;;  %v329_v51 = vld [vmem:[%s2178_s15 + $0x40] sm:$0xff] }
  0xb9   : > { %v348_v54 = vld [vmem:[%s2178_s15 + $0xd8] sm:$0xff]  ;;  %v331_v55 = vld [vmem:[%s2178_s15 + $0x50] sm:$0xff]  ;;  %v334_v57 = vld [vmem:[%s2178_s15 + $0x68] sm:$0xff] }
  0xba   : > { %1280 = vmatpush1.bf16.msra.mxu0 %v1279_v46  ;;  %1339 = vmatpush1.bf16.msra.mxu1 %v1279_v46  ;;  %v344_v46 = vld [vmem:[%s2178_s15 + $0xb8] sm:$0xff]  ;;  %v347_v56 = vld [vmem:[%s2178_s15 + $0xd0] sm:$0xff]  ;;  %v349_v60 = vld [vmem:[%s2178_s15 + $0xe0] sm:$0xff] }
  0xbb   : > { %1282 = vmatprep.subr.bf16.mxu0 %v1281_v47  ;;  %1324 = vmatprep.subr.bf16.mxu1 %v1281_v47  ;;  %v327_v47 = vld [vmem:[%s2178_s15 + $0x30] sm:$0xff]  ;;  %v336_v61 = vld [vmem:[%s2178_s15 + $0x78] sm:$0xff]  ;;  %v433_v2 = vld [vmem:[%s2205_s11 + $0x80] sm:$0xff] }
  0xbc   : > { %v352_v62 = vld [vmem:[%s2178_s15 + $0xf8] sm:$0xff]  ;;  %v335_v63 = vld [vmem:[%s2178_s15 + $0x70] sm:$0xff]  ;;  %v418_v3 = vld [vmem:[%s2205_s11 + $0x8] sm:$0xff] }
  0xbd   : > { %v434_v4 = vld [vmem:[%s2205_s11 + $0x88] sm:$0xff]  ;;  %v435_v14 = vld [vmem:[%s2205_s11 + $0x90] sm:$0xff]  ;;  %v420_v15 = vld [vmem:[%s2205_s11 + $0x18] sm:$0xff] }
  0xbe   : > { %1284 = vmatpush1.bf16.msra.mxu0 %v1283_v52  ;;  %1340 = vmatpush1.bf16.msra.mxu1 %v1283_v52  ;;  %v345_v52 = vld [vmem:[%s2178_s15 + $0xc0] sm:$0xff]  ;;  %v436_v16 = vld [vmem:[%s2205_s11 + $0x98] sm:$0xff]  ;;  %v422_v27 = vld [vmem:[%s2205_s11 + $0x28] sm:$0xff] }
  0xbf   : > { %1286 = vmatprep.subr.bf16.mxu0 %v1285_v53  ;;  %1325 = vmatprep.subr.bf16.mxu1 %v1285_v53  ;;  %v332_v53 = vld [vmem:[%s2178_s15 + $0x58] sm:$0xff]  ;;  %v437_v26 = vld [vmem:[%s2205_s11 + $0xa0] sm:$0xff]  ;;  %v438_v28 = vld [vmem:[%s2205_s11 + $0xa8] sm:$0xff] }
  0xc2   : > { %1288 = vmatpush1.bf16.msra.mxu0 %v1287_v58  ;;  %1341 = vmatpush1.bf16.msra.mxu1 %v1287_v58  ;;  %v350_v58 = vld [vmem:[%s2178_s15 + $0xe8] sm:$0xff] }
  0xc3   : > { %1290 = vmatprep.subr.bf16.mxu0 %v1289_v59  ;;  %1326 = vmatprep.subr.bf16.mxu1 %v1289_v59  ;;  %v333_v59 = vld [vmem:[%s2178_s15 + $0x60] sm:$0xff] }
  0xc6   : > { %1292 = vmatpush1.bf16.msra.mxu0 %v1291_v0  ;;  %1342 = vmatpush1.bf16.msra.mxu1 %v1291_v0  ;;  %v351_v0 = vld [vmem:[%s2178_s15 + $0xf0] sm:$0xff]  ;;  %s2735_s15 = sld [smem:[#allocation11_spill]] }
  0xc7   : > { %1294 = vmatprep.subr.bf16.mxu0 %v1293_v1  ;;  %1327 = vmatprep.subr.bf16.mxu1 %v1293_v1  ;;  %v417_v1 = vld [vmem:[%s2205_s11] sm:$0xff] }
  0xca   : > { %1296 = vmatpush1.bf16.msra.mxu0 %v1295_v6  ;;  %1343 = vmatpush1.bf16.msra.mxu1 %v1295_v6 }
  0xcb   : > { %1298 = vmatprep.subr.bf16.mxu0 %v1297_v7  ;;  %1328 = vmatprep.subr.bf16.mxu1 %v1297_v7 }
  0xcc   : > { %p1210_p13 = scmp.ne.s32.totalorder %s2735_s15, 1 }
  0xce   : > { %1300 = vmatpush1.bf16.msra.mxu0 %v1299_v12  ;;  %1344 = vmatpush1.bf16.msra.mxu1 %v1299_v12 }
  0xcf   : > { %1302 = vmatprep.subr.bf16.mxu0 %v1301_v13  ;;  %1329 = vmatprep.subr.bf16.mxu1 %v1301_v13  ;;  %v419_v13 = vld [vmem:[%s2205_s11 + $0x10] sm:$0xff] }
  0xd2   : > { %1304 = vmatpush1.bf16.msra.mxu0 %v1303_v18  ;;  %1345 = vmatpush1.bf16.msra.mxu1 %v1303_v18 }
  0xd3   : > { %1306 = vmatprep.subr.bf16.mxu0 %v1305_v19  ;;  %1330 = vmatprep.subr.bf16.mxu1 %v1305_v19 }
  0xd6   : > { %1308 = vmatpush1.bf16.msra.mxu0 %v1307_v24  ;;  %1346 = vmatpush1.bf16.msra.mxu1 %v1307_v24 }
  0xd7   : > { %1310 = vmatprep.subr.bf16.mxu0 %v1309_v25  ;;  %1331 = vmatprep.subr.bf16.mxu1 %v1309_v25  ;;  %v421_v25 = vld [vmem:[%s2205_s11 + $0x20] sm:$0xff] }
  0xda   : > { %1312 = vmatpush1.bf16.msra.mxu0 %v1311_v30  ;;  %1347 = vmatpush1.bf16.msra.mxu1 %v1311_v30 }
  0xdb   : > { %1314 = vmatprep.subr.bf16.mxu0 %v1313_v31  ;;  %1332 = vmatprep.subr.bf16.mxu1 %v1313_v31 }
  0xde   : > { %1316 = vmatpush1.bf16.msra.mxu0 %v1315_v34  ;;  %1348 = vmatpush1.bf16.msra.mxu1 %v1315_v34 }
  0xe1   : > { %514 = vmatmul.mubr.f32.vlgmr.msra.gmra.mrb[0].mxu0 %v321_v35  ;;  %562 = vmatmul.mubr.f32.vlgmr.msra.gmra.mrb[0].mxu1 %v337_v36 }
  0xe2   : > { %519 = vmatprep.mubr.f32.mxu0 %v324_v37  ;;  %567 = vmatprep.mubr.f32.mxu1 %v340_v38  ;;  %v423_v37 = vld [vmem:[%s2205_s11 + $0x30] sm:$0xff] }
  0xe3   : > { %v439_v38 = vld [vmem:[%s2205_s11 + $0xb0] sm:$0xff] }
  0xe5   : > { %520 = vmatmul.mubr.f32.gmra.mrb[2].mxu0 %v323_v39  ;;  %568 = vmatmul.mubr.f32.gmra.mrb[2].mxu1 %v339_v40  ;;  %v424_v39 = vld [vmem:[%s2205_s11 + $0x38] sm:$0xff] }
  0xe6   : > { %525 = vmatprep.mubr.f32.mxu0 %v326_v41  ;;  %573 = vmatprep.mubr.f32.mxu1 %v342_v42  ;;  %v440_v40 = vld [vmem:[%s2205_s11 + $0xb8] sm:$0xff] }
  0xe9   : > { %526 = vmatmul.mubr.f32.gmra.mrb[4].mxu0 %v325_v43  ;;  %574 = vmatmul.mubr.f32.gmra.mrb[4].mxu1 %v341_v44 }
  0xea   : > { %531 = vmatprep.mubr.f32.mxu0 %v328_v45  ;;  %579 = vmatprep.mubr.f32.mxu1 %v344_v46 }
  0xed   : > { %532 = vmatmul.mubr.f32.gmra.mrb[6].mxu0 %v327_v47  ;;  %580 = vmatmul.mubr.f32.gmra.mrb[6].mxu1 %v343_v48 }
  0xee   : > { %537 = vmatprep.mubr.f32.mxu0 %v330_v49  ;;  %585 = vmatprep.mubr.f32.mxu1 %v346_v50  ;;  %v425_v49 = vld [vmem:[%s2205_s11 + $0x40] sm:$0xff] }
  0xef   : > { %v441_v50 = vld [vmem:[%s2205_s11 + $0xc0] sm:$0xff] }
  0xf1   : > { %538 = vmatmul.mubr.f32.gmra.mrb[8].mxu0 %v329_v51  ;;  %586 = vmatmul.mubr.f32.gmra.mrb[8].mxu1 %v345_v52  ;;  %v426_v51 = vld [vmem:[%s2205_s11 + $0x48] sm:$0xff] }
  0xf2   : > { %543 = vmatprep.mubr.f32.mxu0 %v332_v53  ;;  %591 = vmatprep.mubr.f32.mxu1 %v348_v54  ;;  %v442_v52 = vld [vmem:[%s2205_s11 + $0xc8] sm:$0xff] }
  0xf5   : > { %544 = vmatmul.mubr.f32.gmra.mrb[10].mxu0 %v331_v55  ;;  %592 = vmatmul.mubr.f32.gmra.mrb[10].mxu1 %v347_v56 }
  0xf6   : > { %549 = vmatprep.mubr.f32.mxu0 %v334_v57  ;;  %597 = vmatprep.mubr.f32.mxu1 %v350_v58 }
  0xf9   : > { %550 = vmatmul.mubr.f32.gmra.mrb[12].mxu0 %v333_v59  ;;  %598 = vmatmul.mubr.f32.gmra.mrb[12].mxu1 %v349_v60 }
  0xfa   : > { %555 = vmatprep.mubr.f32.mxu0 %v336_v61  ;;  %603 = vmatprep.mubr.f32.mxu1 %v352_v62  ;;  %v427_v61 = vld [vmem:[%s2205_s11 + $0x50] sm:$0xff] }
  0xfb   : > { %v443_v62 = vld [vmem:[%s2205_s11 + $0xd0] sm:$0xff] }
  0xfd   : > { %556 = vmatmul.mubr.f32.gmra.mrb[14].mxu0 %v335_v63  ;;  %604 = vmatmul.mubr.f32.gmra.mrb[14].mxu1 %v351_v0  ;;  %v428_v63 = vld [vmem:[%s2205_s11 + $0x58] sm:$0xff] }
  0xfe   : > { %v444_v0 = vld [vmem:[%s2205_s11 + $0xd8] sm:$0xff] }
 0x1b4   : > { %v515_v5 = vpop.f32.mrb[0].mxu0  ;;  %v563_v6 = vpop.f32.mrb[0].mxu1 }
 0x1b5   : > { %v610_v7 = vadd.f32 %v515_v5, %v417_v1  ;;  %v626_v8 = vadd.f32 %v563_v6, %v433_v2  ;;  %v517_v9 = vpop.f32.mrb[1].mxu0  ;;  %v565_v10 = vpop.f32.mrb[1].mxu1 }
 0x1b6   : > { %v611_v11 = vadd.f32 %v517_v9, %v418_v3  ;;  %v627_v12 = vadd.f32 %v565_v10, %v434_v4  ;;  %v429_v9 = vld [vmem:[%s2205_s11 + $0x60] sm:$0xff] }
 0x1b7   : > { %642 = vst [vmem:[%s2205_s11] sm:$0xff] %v610_v7  ;;  %658 = vst [vmem:[%s2205_s11 + $0x80] sm:$0xff] %v626_v8  ;;  %v445_v10 = vld [vmem:[%s2205_s11 + $0xe0] sm:$0xff] }
 0x1b8   : > { %643 = vst [vmem:[%s2205_s11 + $0x8] sm:$0xff] %v611_v11  ;;  %659 = vst [vmem:[%s2205_s11 + $0x88] sm:$0xff] %v627_v12  ;;  %v521_v17 = vpop.f32.mrb[2].mxu0  ;;  %v569_v18 = vpop.f32.mrb[2].mxu1  ;;  %v430_v11 = vld [vmem:[%s2205_s11 + $0x68] sm:$0xff] }
 0x1b9   : > { %v612_v19 = vadd.f32 %v521_v17, %v419_v13  ;;  %v628_v20 = vadd.f32 %v569_v18, %v435_v14  ;;  %v523_v21 = vpop.f32.mrb[3].mxu0  ;;  %v571_v22 = vpop.f32.mrb[3].mxu1  ;;  %v446_v12 = vld [vmem:[%s2205_s11 + $0xe8] sm:$0xff] }
 0x1ba   : > { %v613_v23 = vadd.f32 %v523_v21, %v420_v15  ;;  %v629_v24 = vadd.f32 %v571_v22, %v436_v16  ;;  %v431_v21 = vld [vmem:[%s2205_s11 + $0x70] sm:$0xff] }
 0x1bb   : > { %644 = vst [vmem:[%s2205_s11 + $0x10] sm:$0xff] %v612_v19  ;;  %660 = vst [vmem:[%s2205_s11 + $0x90] sm:$0xff] %v628_v20  ;;  %v447_v22 = vld [vmem:[%s2205_s11 + $0xf0] sm:$0xff] }
 0x1bc   : > { %645 = vst [vmem:[%s2205_s11 + $0x18] sm:$0xff] %v613_v23  ;;  %661 = vst [vmem:[%s2205_s11 + $0x98] sm:$0xff] %v629_v24  ;;  %v527_v29 = vpop.f32.mrb[4].mxu0  ;;  %v575_v30 = vpop.f32.mrb[4].mxu1  ;;  %v432_v23 = vld [vmem:[%s2205_s11 + $0x78] sm:$0xff] }
 0x1bd   : > { %v614_v31 = vadd.f32 %v527_v29, %v421_v25  ;;  %v630_v32 = vadd.f32 %v575_v30, %v437_v26  ;;  %v529_v33 = vpop.f32.mrb[5].mxu0  ;;  %v577_v34 = vpop.f32.mrb[5].mxu1  ;;  %v448_v24 = vld [vmem:[%s2205_s11 + $0xf8] sm:$0xff] }
 0x1be   : > { %v615_v35 = vadd.f32 %v529_v33, %v422_v27  ;;  %v631_v36 = vadd.f32 %v577_v34, %v438_v28  ;;  %v712_v33 = vlaneseq (!%p1210_p13) }
 0x1bf   : > { %646 = vst [vmem:[%s2205_s11 + $0x20] sm:$0xff] %v614_v31  ;;  %662 = vst [vmem:[%s2205_s11 + $0xa0] sm:$0xff] %v630_v32 }
 0x1c0   : > { %647 = vst [vmem:[%s2205_s11 + $0x28] sm:$0xff] %v615_v35  ;;  %663 = vst [vmem:[%s2205_s11 + $0xa8] sm:$0xff] %v631_v36  ;;  %v533_v41 = vpop.f32.mrb[6].mxu0  ;;  %v581_v42 = vpop.f32.mrb[6].mxu1  ;;  %v713_v34 = vshrl.u32 (!%p1210_p13), %v712_v33, 7  ;;  %v678_v36 = vld [vmem:[%s2205_s11] sm:$0xff] (!%p1210_p13) }
 0x1c1   : > { %v616_v43 = vadd.f32 %v533_v41, %v423_v37  ;;  %v632_v44 = vadd.f32 %v581_v42, %v439_v38  ;;  %v535_v45 = vpop.f32.mrb[7].mxu0  ;;  %v583_v46 = vpop.f32.mrb[7].mxu1  ;;  %v710_v35 = vld [vmem:[%s281_s9] sm:$0x3] (!%p1210_p13) }
 0x1c2   : > { %v617_v47 = vadd.f32 %v535_v45, %v424_v39  ;;  %v633_v48 = vadd.f32 %v583_v46, %v440_v40  ;;  %v714_v37 = vsub.s32 (!%p1210_p13), 0, %v713_v34  ;;  %v718_v38 = vsub.s32 (!%p1210_p13), 1, %v713_v34  ;;  %v679_v39 = vld [vmem:[%s2205_s11 + $0x8] sm:$0xff] (!%p1210_p13)  ;;  %v680_v40 = vld [vmem:[%s2205_s11 + $0x10] sm:$0xff] (!%p1210_p13) }
 0x1c3   : > { %648 = vst [vmem:[%s2205_s11 + $0x30] sm:$0xff] %v616_v43  ;;  %664 = vst [vmem:[%s2205_s11 + $0xb0] sm:$0xff] %v632_v44  ;;  %v681_v41 = vld [vmem:[%s2205_s11 + $0x18] sm:$0xff] (!%p1210_p13) }
 0x1c4   : > { %649 = vst [vmem:[%s2205_s11 + $0x38] sm:$0xff] %v617_v47  ;;  %665 = vst [vmem:[%s2205_s11 + $0xb8] sm:$0xff] %v633_v48  ;;  %v539_v53 = vpop.f32.mrb[8].mxu0  ;;  %v587_v54 = vpop.f32.mrb[8].mxu1  ;;  %v2410_v42 = vrot.slane (!%p1210_p13), %v710_v35, %v714_v37  ;;  %v2412_v43 = vrot.slane (!%p1210_p13), %v710_v35, %v718_v38 }
 0x1c5   : > { %v618_v55 = vadd.f32 %v539_v53, %v425_v49  ;;  %v634_v56 = vadd.f32 %v587_v54, %v441_v50  ;;  %v541_v57 = vpop.f32.mrb[9].mxu0  ;;  %v589_v58 = vpop.f32.mrb[9].mxu1 }
 0x1c6   : > { %v619_v59 = vadd.f32 %v541_v57, %v426_v51  ;;  %v635_v60 = vadd.f32 %v589_v58, %v442_v52  ;;  %v682_v44 = vld [vmem:[%s2205_s11 + $0x20] sm:$0xff] (!%p1210_p13)  ;;  %v722_v48 = vadd.f32 (!%p1210_p13), %v2410_v42, %v678_v36  ;;  %v723_v49 = vadd.f32 (!%p1210_p13), %v2412_v43, %v679_v39 }
 0x1c7   : > { %650 = vst [vmem:[%s2205_s11 + $0x40] sm:$0xff] %v618_v55  ;;  %666 = vst [vmem:[%s2205_s11 + $0xc0] sm:$0xff] %v634_v56  ;;  %v683_v45 = vld [vmem:[%s2205_s11 + $0x28] sm:$0xff] (!%p1210_p13)  ;;  %v724_v50 = vadd.f32 (!%p1210_p13), %v2410_v42, %v680_v40  ;;  %v725_v51 = vadd.f32 (!%p1210_p13), %v2412_v43, %v681_v41  ;;  %v726_v52 = vadd.f32 (!%p1210_p13), %v2410_v42, %v682_v44 }
 0x1c8   : > { %651 = vst [vmem:[%s2205_s11 + $0x48] sm:$0xff] %v619_v59  ;;  %667 = vst [vmem:[%s2205_s11 + $0xc8] sm:$0xff] %v635_v60  ;;  %v545_v1 = vpop.f32.mrb[10].mxu0  ;;  %v593_v2 = vpop.f32.mrb[10].mxu1  ;;  %v727_v53 = vadd.f32 (!%p1210_p13), %v2412_v43, %v683_v45  ;;  %v786_v54 = vmul.f32 (!%p1210_p13), 0.5, %v722_v48  ;;  %v787_v55 = vmul.f32 (!%p1210_p13), 0.5, %v723_v49 }
 0x1c9   : > { %v620_v3 = vadd.f32 %v545_v1, %v427_v61  ;;  %v636_v4 = vadd.f32 %v593_v2, %v443_v62  ;;  %v547_v5 = vpop.f32.mrb[11].mxu0  ;;  %v595_v6 = vpop.f32.mrb[11].mxu1  ;;  %v2426_v58 = vmul.f32 (!%p1210_p13), 0.25, %v722_v48  ;;  %v2428_v59 = vmul.f32 (!%p1210_p13), 0.25, %v723_v49  ;;  %v696_v48 = vld [vmem:[%s2205_s11 + $0x90] sm:$0xff] (!%p1210_p13) }
 0x1ca   : > { %v621_v7 = vadd.f32 %v547_v5, %v428_v63  ;;  %v637_v8 = vadd.f32 %v595_v6, %v444_v0  ;;  %v684_v46 = vld [vmem:[%s2205_s11 + $0x30] sm:$0xff] (!%p1210_p13)  ;;  %v788_v60 = vmul.f32 (!%p1210_p13), 0.5, %v724_v50  ;;  %v789_v61 = vmul.f32 (!%p1210_p13), 0.5, %v725_v51 }
 0x1cb   : > { %652 = vst [vmem:[%s2205_s11 + $0x50] sm:$0xff] %v620_v3  ;;  %668 = vst [vmem:[%s2205_s11 + $0xd0] sm:$0xff] %v636_v4  ;;  %v685_v47 = vld [vmem:[%s2205_s11 + $0x38] sm:$0xff] (!%p1210_p13)  ;;  %v728_v56 = vadd.f32 (!%p1210_p13), %v2410_v42, %v684_v46  ;;  %1503 = vtanh.f32 (!%p1210_p13), %v786_v54  ;;  %v2431_v63 = vmul.f32 (!%p1210_p13), 0.25, %v724_v50  ;;  %v2433_v0 = vmul.f32 (!%p1210_p13), 0.25, %v725_v51 }
 0x1cc   : > { %653 = vst [vmem:[%s2205_s11 + $0x58] sm:$0xff] %v621_v7  ;;  %669 = vst [vmem:[%s2205_s11 + $0xd8] sm:$0xff] %v637_v8  ;;  %v551_v13 = vpop.f32.mrb[12].mxu0  ;;  %v599_v14 = vpop.f32.mrb[12].mxu1  ;;  %v729_v57 = vadd.f32 (!%p1210_p13), %v2412_v43, %v685_v47  ;;  %v790_v1 = vmul.f32 (!%p1210_p13), 0.5, %v726_v52  ;;  %1505 = vtanh.f32 (!%p1210_p13), %v787_v55  ;;  %v2438_v5 = vmul.f32 (!%p1210_p13), 0.25, %v726_v52 }
 0x1cd   : > { %v622_v15 = vadd.f32 %v551_v13, %v429_v9  ;;  %v638_v16 = vadd.f32 %v599_v14, %v445_v10  ;;  %v553_v17 = vpop.f32.mrb[13].mxu0  ;;  %v601_v18 = vpop.f32.mrb[13].mxu1  ;;  %v2440_v6 = vmul.f32 (!%p1210_p13), 0.25, %v727_v53  ;;  %v791_v7 = vmul.f32 (!%p1210_p13), 0.5, %v727_v53 }
 0x1ce   : > { %v623_v19 = vadd.f32 %v553_v17, %v430_v11  ;;  %v639_v20 = vadd.f32 %v601_v18, %v446_v12  ;;  %677 = sbr.rel (%p1210_p13) target bundleno = 542 (0x21e), region = 48  ;;  %v686_v62 = vld [vmem:[%s2205_s11 + $0x40] sm:$0xff] (!%p1210_p13)  ;;  %1507 = vtanh.f32 (!%p1210_p13), %v788_v60  ;;  %v792_v9 = vmul.f32 (!%p1210_p13), 0.5, %v728_v56 }
 0x1cf   : > { %654 = vst [vmem:[%s2205_s11 + $0x60] sm:$0xff] %v622_v15  ;;  %670 = vst [vmem:[%s2205_s11 + $0xe0] sm:$0xff] %v638_v16  ;;  %v687_v2 = vld [vmem:[%s2205_s11 + $0x48] sm:$0xff] (!%p1210_p13)  ;;  %v793_v10 = vmul.f32 (!%p1210_p13), 0.5, %v729_v57  ;;  %v730_v11 = vadd.f32 (!%p1210_p13), %v2410_v42, %v686_v62  ;;  %1509 = vtanh.f32 (!%p1210_p13), %v789_v61  ;;  %v2447_v15 = vmul.f32 (!%p1210_p13), 0.25, %v728_v56 }
 0x1d0   : > { %655 = vst [vmem:[%s2205_s11 + $0x68] sm:$0xff] %v623_v19  ;;  %671 = vst [vmem:[%s2205_s11 + $0xe8] sm:$0xff] %v639_v20  ;;  %v557_v25 = vpop.f32.mrb[14].mxu0  ;;  %v605_v26 = vpop.f32.mrb[14].mxu1  ;;  %v731_v12 = vadd.f32 (!%p1210_p13), %v2412_v43, %v687_v2  ;;  %1511 = vtanh.f32 (!%p1210_p13), %v790_v1  ;;  %v2451_v19 = vmul.f32 (!%p1210_p13), 0.25, %v729_v57  ;;  %v2486_v62 = vadd.f32 (!%p1210_p13), %v2410_v42, %v696_v48 }
 0x1d1   : > { %v624_v27 = vadd.f32 %v557_v25, %v431_v21  ;;  %v640_v28 = vadd.f32 %v605_v26, %v447_v22  ;;  %v559_v29 = vpop.f32.mrb[15].mxu0  ;;  %v607_v30 = vpop.f32.mrb[15].mxu1  ;;  %v794_v16 = vmul.f32 (!%p1210_p13), 0.5, %v730_v11  ;;  %1513 = vtanh.f32 (!%p1210_p13), %v791_v7 }
 0x1d2   : > { %v625_v31 = vadd.f32 %v559_v29, %v432_v23  ;;  %v641_v32 = vadd.f32 %v607_v30, %v448_v24  ;;  %v688_v3 = vld [vmem:[%s2205_s11 + $0x50] sm:$0xff] (!%p1210_p13)  ;;  %v2453_v20 = vmul.f32 (!%p1210_p13), 0.25, %v730_v11  ;;  %v795_v21 = vmul.f32 (!%p1210_p13), 0.5, %v731_v12  ;;  %v694_v24 = vld [vmem:[%s2205_s11 + $0x80] sm:$0xff] (!%p1210_p13) }
 0x1d3   : > { %656 = vst [vmem:[%s2205_s11 + $0x70] sm:$0xff] %v624_v27  ;;  %672 = vst [vmem:[%s2205_s11 + $0xf0] sm:$0xff] %v640_v28  ;;  %v689_v4 = vld [vmem:[%s2205_s11 + $0x58] sm:$0xff] (!%p1210_p13)  ;;  %v732_v13 = vadd.f32 (!%p1210_p13), %v2410_v42, %v688_v3  ;;  %1515 = vtanh.f32 (!%p1210_p13), %v792_v9  ;;  %v2458_v25 = vmul.f32 (!%p1210_p13), 0.25, %v731_v12  ;;  %v738_v34 = vadd.f32 (!%p1210_p13), %v2410_v42, %v694_v24 }
 0x1d4   : > { %657 = vst [vmem:[%s2205_s11 + $0x78] sm:$0xff] %v625_v31  ;;  %673 = vst [vmem:[%s2205_s11 + $0xf8] sm:$0xff] %v641_v32  ;;  %v733_v14 = vadd.f32 (!%p1210_p13), %v2412_v43, %v689_v4  ;;  %1517 = vtanh.f32 (!%p1210_p13), %v793_v10  ;;  %v695_v31 = vld [vmem:[%s2205_s11 + $0x88] sm:$0xff] (!%p1210_p13) }
 0x1d5   : > { %v2460_v26 = vmul.f32 0.25, %v732_v13  ;;  %v796_v27 = vmul.f32 0.5, %v732_v13  ;;  %1519 = vtanh.f32 %v794_v16  ;;  %v1504_v38 = vpop.eup %1503  ;;  %v2474_v41 = vadd.f32 %v2412_v43, %v695_v31 }
 0x1d6   : > { %v690_v8 = vld [vmem:[%s2205_s11 + $0x60] sm:$0xff]  ;;  %v797_v28 = vmul.f32 0.5, %v733_v14  ;;  %1521 = vtanh.f32 %v795_v21  ;;  %v2467_v35 = vmul.f32 0.25, %v733_v14  ;;  %v1506_v44 = vpop.eup %1505  ;;  %v850_v45 = vadd.f32 1.0, %v1504_v38 }
 0x1d7   : > { %v734_v17 = vadd.f32 %v2410_v42, %v690_v8  ;;  %v691_v18 = vld [vmem:[%s2205_s11 + $0x68] sm:$0xff]  ;;  %1523 = vtanh.f32 %v796_v27  ;;  %v851_v50 = vadd.f32 1.0, %v1506_v44  ;;  %v802_v52 = vmul.f32 0.5, %v738_v34 }
 0x1d8   : > { %v735_v30 = vadd.f32 %v2412_v43, %v691_v18  ;;  %1525 = vtanh.f32 %v797_v28  ;;  %v1508_v49 = vpop.eup %1507  ;;  %v882_v54 = vmul.f32 %v850_v45, %v2426_v58  ;;  %v2482_v56 = vmul.f32 0.25, %v738_v34 }
 0x1d9   : > { %v798_v29 = vmul.f32 0.5, %v734_v17  ;;  %v2469_v36 = vmul.f32 0.25, %v734_v17  ;;  %v1510_v53 = vpop.eup %1509  ;;  %v852_v55 = vadd.f32 1.0, %v1508_v49  ;;  %v883_v60 = vmul.f32 %v851_v50, %v2428_v59 }
 0x1da   : > { %v692_v22 = vld [vmem:[%s2205_s11 + $0x70] sm:$0xff]  ;;  %v799_v37 = vmul.f32 0.5, %v735_v30  ;;  %v2471_v39 = vmul.f32 0.25, %v735_v30  ;;  %v1512_v57 = vpop.eup %1511  ;;  %v853_v61 = vadd.f32 1.0, %v1510_v53  ;;  %v1211_v2 = vclamps-f32 %v882_v54, 1.0 }
 0x1db   : > { %v693_v23 = vld [vmem:[%s2205_s11 + $0x78] sm:$0xff]  ;;  %v736_v32 = vadd.f32 %v2410_v42, %v692_v22  ;;  %1527 = vtanh.f32 %v798_v29  ;;  %v1514_v1 = vpop.eup %1513  ;;  %v884_v3 = vmul.f32 %v852_v55, %v2431_v63  ;;  %v854_v4 = vadd.f32 1.0, %v1512_v57 }
 0x1dc   : > { %v737_v33 = vadd.f32 %v2412_v43, %v693_v23  ;;  %1529 = vtanh.f32 %v799_v37  ;;  %v1212_v58 = vclamps-f32 %v883_v60, 1.0  ;;  %v885_v8 = vmul.f32 %v853_v61, %v2433_v0  ;;  %v697_v57 = vld [vmem:[%s2205_s11 + $0x98] sm:$0xff]  ;;  %v698_v60 = vld [vmem:[%s2205_s11 + $0xa0] sm:$0xff] }
 0x1dd   : > { %v800_v40 = vmul.f32 0.5, %v736_v32  ;;  %v2476_v46 = vmul.f32 0.25, %v736_v32  ;;  %v1516_v7 = vpop.eup %1515  ;;  %v855_v9 = vadd.f32 1.0, %v1514_v1  ;;  %v1213_v59 = vclamps-f32 %v884_v3, 1.0  ;;  %v700_v3 = vld [vmem:[%s2205_s11 + $0xb0] sm:$0xff] }
 0x1de   : > { %v801_v47 = vmul.f32 0.5, %v737_v33  ;;  %v2479_v51 = vmul.f32 0.25, %v737_v33  ;;  %v1518_v10 = vpop.eup %1517  ;;  %v886_v11 = vmul.f32 %v854_v4, %v2438_v5  ;;  %v856_v12 = vadd.f32 1.0, %v1516_v7 }
 0x1df   : > { %1531 = vtanh.f32 %v800_v40  ;;  %v1520_v13 = vpop.eup %1519  ;;  %v1214_v14 = vclamps-f32 %v885_v8, 1.0  ;;  %v887_v16 = vmul.f32 %v855_v9, %v2440_v6  ;;  %v857_v63 = vadd.f32 1.0, %v1518_v10 }
 0x1e0   : > { %1533 = vtanh.f32 %v801_v47  ;;  %v1522_v17 = vpop.eup %1521  ;;  %v1215_v18 = vclamps-f32 %v886_v11, 1.0  ;;  %v888_v21 = vmul.f32 %v856_v12, %v2447_v15  ;;  %v858_v0 = vadd.f32 1.0, %v1520_v13  ;;  %v701_v13 = vld [vmem:[%s2205_s11 + $0xb8] sm:$0xff] }
 0x1e1   : > { %1535 = vtanh.f32 %v802_v52  ;;  %v1524_v22 = vpop.eup %1523  ;;  %v1216_v23 = vclamps-f32 %v887_v16, 1.0  ;;  %v889_v24 = vmul.f32 %v857_v63, %v2451_v19  ;;  %v859_v27 = vadd.f32 1.0, %v1522_v17  ;;  %v702_v63 = vld [vmem:[%s2205_s11 + $0xc0] sm:$0xff]  ;;  %v703_v17 = vld [vmem:[%s2205_s11 + $0xc8] sm:$0xff] }
 0x1e2   : > { %1537 = vtanh.f32 %v1211_v2  ;;  %v1526_v5 = vpop.eup %1525  ;;  %v1217_v28 = vclamps-f32 %v888_v21, 1.0  ;;  %v890_v29 = vmul.f32 %v858_v0, %v2453_v20  ;;  %v860_v30 = vadd.f32 1.0, %v1524_v22  ;;  %v699_v2 = vld [vmem:[%s2205_s11 + $0xa8] sm:$0xff]  ;;  %v705_v22 = vld [vmem:[%s2205_s11 + $0xd8] sm:$0xff] }
 0x1e3   : > { %1539 = vtanh.f32 %v1212_v58  ;;  %v1218_v31 = vclamps-f32 %v889_v24, 1.0  ;;  %v891_v32 = vmul.f32 %v859_v27, %v2458_v25  ;;  %v861_v33 = vadd.f32 1.0, %v1526_v5 }
 0x1e4   : > { %1541 = vtanh.f32 %v1213_v59  ;;  %v1219_v34 = vclamps-f32 %v890_v29, 1.0  ;;  %v892_v37 = vmul.f32 %v860_v30, %v2460_v26  ;;  %v804_v58 = vmul.f32 0.5, %v2486_v62 }
 0x1e5   : > { %1543 = vtanh.f32 %v1214_v14  ;;  %v1528_v6 = vpop.eup %1527  ;;  %v1220_v40 = vclamps-f32 %v891_v32, 1.0  ;;  %v893_v44 = vmul.f32 %v861_v33, %v2467_v35  ;;  %v2513_v9 = vadd.f32 %v2412_v43, %v697_v57 }
 0x1e6   : > { %1545 = vtanh.f32 %v1215_v18  ;;  %v1530_v15 = vpop.eup %1529  ;;  %v862_v38 = vadd.f32 1.0, %v1528_v6  ;;  %v1221_v47 = vclamps-f32 %v892_v37, 1.0  ;;  %v2516_v10 = vadd.f32 %v2410_v42, %v698_v60  ;;  %v704_v18 = vld [vmem:[%s2205_s11 + $0xd0] sm:$0xff] }
 0x1e7   : > { %1547 = vtanh.f32 %v1216_v23  ;;  %v863_v45 = vadd.f32 1.0, %v1530_v15  ;;  %v1222_v50 = vclamps-f32 %v893_v44, 1.0  ;;  %v2520_v11 = vadd.f32 %v2412_v43, %v699_v2  ;;  %v706_v15 = vld [vmem:[%s2205_s11 + $0xe0] sm:$0xff] }
 0x1e8   : > { %1549 = vtanh.f32 %v1217_v28  ;;  %v894_v25 = vmul.f32 %v862_v38, %v2469_v36  ;;  %v2523_v12 = vadd.f32 %v2410_v42, %v700_v3  ;;  %v805_v16 = vmul.f32 0.5, %v2513_v9  ;;  %v707_v38 = vld [vmem:[%s2205_s11 + $0xe8] sm:$0xff] }
 0x1e9   : > { %v1532_v19 = vpop.eup %1531  ;;  %1551 = vtanh.f32 %v1218_v31  ;;  %v895_v26 = vmul.f32 %v863_v45, %v2471_v39  ;;  %v803_v39 = vmul.f32 0.5, %v2474_v41  ;;  %v806_v0 = vmul.f32 0.5, %v2516_v10 }
 0x1ea   : > { %v1534_v20 = vpop.eup %1533  ;;  %1553 = vtanh.f32 %v1219_v34  ;;  %v864_v48 = vadd.f32 1.0, %v1532_v19  ;;  %v1223_v35 = vclamps-f32 %v894_v25, 1.0  ;;  %v807_v24 = vmul.f32 0.5, %v2520_v11  ;;  %v708_v19 = vld [vmem:[%s2205_s11 + $0xf0] sm:$0xff] }
 0x1eb   : > { %v1536_v49 = vpop.eup %1535  ;;  %1555 = vtanh.f32 %v1220_v40  ;;  %v865_v52 = vadd.f32 1.0, %v1534_v20  ;;  %v1224_v61 = vclamps-f32 %v895_v26, 1.0  ;;  %v808_v27 = vmul.f32 0.5, %v2523_v12  ;;  %v709_v40 = vld [vmem:[%s2205_s11 + $0xf8] sm:$0xff] }
 0x1ec   : > { %v1538_v53 = vpop.eup %1537  ;;  %1557 = vtanh.f32 %v1221_v47  ;;  %v896_v54 = vmul.f32 %v864_v48, %v2476_v46  ;;  %v866_v55 = vadd.f32 1.0, %v1536_v49  ;;  %v745_v5 = vadd.f32 %v2412_v43, %v701_v13 }
 0x1ed   : > { %v1540_v36 = vpop.eup %1539  ;;  %1010 = vst [vmem:[%s2205_s11] sm:$0xff] %v1538_v53  ;;  %1559 = vtanh.f32 %v1222_v50  ;;  %v897_v1 = vmul.f32 %v865_v52, %v2479_v51  ;;  %v746_v29 = vadd.f32 %v2410_v42, %v702_v63  ;;  %v747_v30 = vadd.f32 %v2412_v43, %v703_v17 }
 0x1ee   : > { %v1542_v4 = vpop.eup %1541  ;;  %1011 = vst [vmem:[%s2205_s11 + $0x8] sm:$0xff] %v1540_v36  ;;  %1561 = vtanh.f32 %v1223_v35  ;;  %v1225_v46 = vclamps-f32 %v896_v54, 1.0  ;;  %v898_v7 = vmul.f32 %v866_v55, %v2482_v56  ;;  %v748_v6 = vadd.f32 %v2410_v42, %v704_v18 }
 0x1ef   : > { %v1544_v8 = vpop.eup %1543  ;;  %1012 = vst [vmem:[%s2205_s11 + $0x10] sm:$0xff] %v1542_v4  ;;  %1563 = vtanh.f32 %v1224_v61  ;;  %v1226_v51 = vclamps-f32 %v897_v1, 1.0  ;;  %v809_v32 = vmul.f32 0.5, %v745_v5  ;;  %v749_v33 = vadd.f32 %v2412_v43, %v705_v22 }
 0x1f0   : > { %v1546_v59 = vpop.eup %1545  ;;  %1013 = vst [vmem:[%s2205_s11 + $0x18] sm:$0xff] %v1544_v8  ;;  %1565 = vtanh.f32 %v1225_v46  ;;  %v1227_v56 = vclamps-f32 %v898_v7, 1.0  ;;  %v810_v37 = vmul.f32 0.5, %v746_v29  ;;  %v811_v45 = vmul.f32 0.5, %v747_v30 }
 0x1f1   : > { %v1548_v14 = vpop.eup %1547  ;;  %1014 = vst [vmem:[%s2205_s11 + $0x20] sm:$0xff] %v1546_v59  ;;  %1567 = vtanh.f32 %v1226_v51  ;;  %v812_v47 = vmul.f32 0.5, %v748_v6  ;;  %v813_v25 = vmul.f32 0.5, %v749_v33  ;;  %v750_v48 = vadd.f32 %v2410_v42, %v706_v15 }
 0x1f2   : > { %v1550_v21 = vpop.eup %1549  ;;  %1015 = vst [vmem:[%s2205_s11 + $0x28] sm:$0xff] %v1548_v14  ;;  %1569 = vtanh.f32 %v1227_v56  ;;  %v751_v50 = vadd.f32 %v2412_v43, %v707_v38  ;;  %v752_v26 = vadd.f32 %v2410_v42, %v708_v19  ;;  %v753_v52 = vadd.f32 %v2412_v43, %v709_v40 }
 0x1f3   : > { %v1552_v23 = vpop.eup %1551  ;;  %1016 = vst [vmem:[%s2205_s11 + $0x30] sm:$0xff] %v1550_v21  ;;  %1571 = vtanh.f32 %v803_v39  ;;  %v771_v35 = vmul.f32 0.25, %v2474_v41  ;;  %v814_v54 = vmul.f32 0.5, %v750_v48  ;;  %v772_v57 = vmul.f32 0.25, %v2486_v62 }
 0x1f4   : > { %v1554_v28 = vpop.eup %1553  ;;  %1017 = vst [vmem:[%s2205_s11 + $0x38] sm:$0xff] %v1552_v23  ;;  %1573 = vtanh.f32 %v804_v58  ;;  %v773_v60 = vmul.f32 0.25, %v2513_v9  ;;  %v815_v36 = vmul.f32 0.5, %v751_v50  ;;  %v774_v42 = vmul.f32 0.25, %v2516_v10 }
 0x1f5   : > { %v1556_v31 = vpop.eup %1555  ;;  %1018 = vst [vmem:[%s2205_s11 + $0x40] sm:$0xff] %v1554_v28  ;;  %1575 = vtanh.f32 %v805_v16  ;;  %v775_v43 = vmul.f32 0.25, %v2520_v11  ;;  %v816_v1 = vmul.f32 0.5, %v752_v26  ;;  %v776_v39 = vmul.f32 0.25, %v2523_v12 }
 0x1f6   : > { %v1558_v34 = vpop.eup %1557  ;;  %1019 = vst [vmem:[%s2205_s11 + $0x48] sm:$0xff] %v1556_v31  ;;  %1577 = vtanh.f32 %v806_v0  ;;  %v777_v2 = vmul.f32 0.25, %v745_v5  ;;  %v817_v3 = vmul.f32 0.5, %v753_v52  ;;  %v778_v46 = vmul.f32 0.25, %v746_v29 }
 0x1f7   : > { %v1560_v44 = vpop.eup %1559  ;;  %1020 = vst [vmem:[%s2205_s11 + $0x50] sm:$0xff] %v1558_v34  ;;  %1579 = vtanh.f32 %v807_v24  ;;  %v779_v7 = vmul.f32 0.25, %v747_v30  ;;  %v780_v51 = vmul.f32 0.25, %v748_v6  ;;  %v781_v9 = vmul.f32 0.25, %v749_v33 }
 0x1f8   : > { %v1562_v20 = vpop.eup %1561  ;;  %1021 = vst [vmem:[%s2205_s11 + $0x58] sm:$0xff] %v1560_v44  ;;  %1581 = vtanh.f32 %v808_v27  ;;  %v782_v11 = vmul.f32 0.25, %v750_v48  ;;  %v783_v16 = vmul.f32 0.25, %v751_v50  ;;  %v784_v0 = vmul.f32 0.25, %v752_v26 }
 0x1f9   : > { %v1564_v49 = vpop.eup %1563  ;;  %1022 = vst [vmem:[%s2205_s11 + $0x60] sm:$0xff] %v1562_v20  ;;  %1583 = vtanh.f32 %v809_v32  ;;  %v785_v5 = vmul.f32 0.25, %v753_v52 }
 0x1fa   : > { %v1566_v53 = vpop.eup %1565  ;;  %1023 = vst [vmem:[%s2205_s11 + $0x68] sm:$0xff] %v1564_v49  ;;  %1585 = vtanh.f32 %v810_v37 }
 0x1fb   : > { %v1568_v55 = vpop.eup %1567  ;;  %1024 = vst [vmem:[%s2205_s11 + $0x70] sm:$0xff] %v1566_v53  ;;  %1587 = vtanh.f32 %v811_v45 }
 0x1fc   : > { %v1570_v61 = vpop.eup %1569  ;;  %1025 = vst [vmem:[%s2205_s11 + $0x78] sm:$0xff] %v1568_v55  ;;  %1589 = vtanh.f32 %v812_v47 }
 0x1fd   : > { %v1572_v41 = vpop.eup %1571  ;;  %1026 = vst [vmem:[%s2205_s11 + $0x80] sm:$0xff] %v1570_v61  ;;  %1591 = vtanh.f32 %v813_v25 }
 0x1fe   : > { %v1574_v62 = vpop.eup %1573  ;;  %v867_v4 = vadd.f32 1.0, %v1572_v41  ;;  %1593 = vtanh.f32 %v814_v54 }
 0x1ff   : > { %v1576_v58 = vpop.eup %1575  ;;  %v868_v8 = vadd.f32 1.0, %v1574_v62  ;;  %1595 = vtanh.f32 %v815_v36 }
 0x200   : > { %v1578_v10 = vpop.eup %1577  ;;  %v899_v59 = vmul.f32 %v867_v4, %v771_v35  ;;  %v869_v56 = vadd.f32 1.0, %v1576_v58  ;;  %1597 = vtanh.f32 %v816_v1 }
 0x201   : > { %v1580_v13 = vpop.eup %1579  ;;  %v900_v12 = vmul.f32 %v868_v8, %v772_v57  ;;  %v870_v14 = vadd.f32 1.0, %v1578_v10  ;;  %1599 = vtanh.f32 %v817_v3 }
 0x202   : > { %v1582_v63 = vpop.eup %1581  ;;  %v1228_v17 = vclamps-f32 %v899_v59, 1.0  ;;  %v901_v18 = vmul.f32 %v869_v56, %v773_v60  ;;  %v871_v21 = vadd.f32 1.0, %v1580_v13 }
 0x203   : > { %v1584_v22 = vpop.eup %1583  ;;  %v1229_v23 = vclamps-f32 %v900_v12, 1.0  ;;  %v902_v24 = vmul.f32 %v870_v14, %v774_v42  ;;  %v872_v27 = vadd.f32 1.0, %v1582_v63 }
 0x204   : > { %v1586_v28 = vpop.eup %1585  ;;  %1601 = vtanh.f32 %v1228_v17  ;;  %v1230_v29 = vclamps-f32 %v901_v18, 1.0  ;;  %v903_v30 = vmul.f32 %v871_v21, %v775_v43  ;;  %v873_v6 = vadd.f32 1.0, %v1584_v22 }
 0x205   : > { %v1588_v31 = vpop.eup %1587  ;;  %1603 = vtanh.f32 %v1229_v23  ;;  %v1231_v32 = vclamps-f32 %v902_v24, 1.0  ;;  %v904_v33 = vmul.f32 %v872_v27, %v776_v39  ;;  %v874_v15 = vadd.f32 1.0, %v1586_v28 }
 0x206   : > { %v1590_v34 = vpop.eup %1589  ;;  %1605 = vtanh.f32 %v1230_v29  ;;  %v1232_v37 = vclamps-f32 %v903_v30, 1.0  ;;  %v905_v38 = vmul.f32 %v873_v6, %v777_v2  ;;  %v875_v19 = vadd.f32 1.0, %v1588_v31 }
 0x207   : > { %v1592_v40 = vpop.eup %1591  ;;  %1607 = vtanh.f32 %v1231_v32  ;;  %v1233_v44 = vclamps-f32 %v904_v33, 1.0  ;;  %v906_v45 = vmul.f32 %v874_v15, %v778_v46  ;;  %v876_v20 = vadd.f32 1.0, %v1590_v34 }
 0x208   : > { %v1594_v47 = vpop.eup %1593  ;;  %1609 = vtanh.f32 %v1232_v37  ;;  %v1234_v25 = vclamps-f32 %v905_v38, 1.0  ;;  %v907_v48 = vmul.f32 %v875_v19, %v779_v7  ;;  %v877_v49 = vadd.f32 1.0, %v1592_v40 }
 0x209   : > { %v1596_v50 = vpop.eup %1595  ;;  %1611 = vtanh.f32 %v1233_v44  ;;  %v1235_v26 = vclamps-f32 %v906_v45, 1.0  ;;  %v908_v52 = vmul.f32 %v876_v20, %v780_v51  ;;  %v878_v53 = vadd.f32 1.0, %v1594_v47 }
 0x20a   : > { %v1598_v35 = vpop.eup %1597  ;;  %1613 = vtanh.f32 %v1234_v25  ;;  %v1236_v54 = vclamps-f32 %v907_v48, 1.0  ;;  %v909_v55 = vmul.f32 %v877_v49, %v781_v9  ;;  %v879_v57 = vadd.f32 1.0, %v1596_v50 }
 0x20b   : > { %v1600_v60 = vpop.eup %1599  ;;  %1615 = vtanh.f32 %v1235_v26  ;;  %v1237_v36 = vclamps-f32 %v908_v52, 1.0  ;;  %v910_v61 = vmul.f32 %v878_v53, %v782_v11  ;;  %v880_v42 = vadd.f32 1.0, %v1598_v35 }
 0x20c   : > { %1617 = vtanh.f32 %v1236_v54  ;;  %v1238_v43 = vclamps-f32 %v909_v55, 1.0  ;;  %v911_v1 = vmul.f32 %v879_v57, %v783_v16  ;;  %v881_v41 = vadd.f32 1.0, %v1600_v60 }
 0x20d   : > { %1619 = vtanh.f32 %v1237_v36  ;;  %v1239_v39 = vclamps-f32 %v910_v61, 1.0  ;;  %v912_v2 = vmul.f32 %v880_v42, %v784_v0 }
 0x20e   : > { %v1602_v3 = vpop.eup %1601  ;;  %1621 = vtanh.f32 %v1238_v43  ;;  %v1240_v62 = vclamps-f32 %v911_v1, 1.0  ;;  %v913_v4 = vmul.f32 %v881_v41, %v785_v5 }
 0x20f   : > { %v1604_v46 = vpop.eup %1603  ;;  %1027 = vst [vmem:[%s2205_s11 + $0x88] sm:$0xff] %v1602_v3  ;;  %1623 = vtanh.f32 %v1239_v39  ;;  %v1241_v7 = vclamps-f32 %v912_v2, 1.0 }
 0x210   : > { %v1606_v58 = vpop.eup %1605  ;;  %1028 = vst [vmem:[%s2205_s11 + $0x90] sm:$0xff] %v1604_v46  ;;  %1625 = vtanh.f32 %v1240_v62  ;;  %v1242_v8 = vclamps-f32 %v913_v4, 1.0 }
 0x211   : > { %v1608_v51 = vpop.eup %1607  ;;  %1029 = vst [vmem:[%s2205_s11 + $0x98] sm:$0xff] %v1606_v58  ;;  %1627 = vtanh.f32 %v1241_v7 }
 0x212   : > { %v1610_v9 = vpop.eup %1609  ;;  %1030 = vst [vmem:[%s2205_s11 + $0xa0] sm:$0xff] %v1608_v51  ;;  %1629 = vtanh.f32 %v1242_v8 }
 0x213   : > { %v1612_v10 = vpop.eup %1611  ;;  %1031 = vst [vmem:[%s2205_s11 + $0xa8] sm:$0xff] %v1610_v9 }
 0x214   : > { %v1614_v59 = vpop.eup %1613  ;;  %1032 = vst [vmem:[%s2205_s11 + $0xb0] sm:$0xff] %v1612_v10 }
 0x215   : > { %v1616_v56 = vpop.eup %1615  ;;  %1033 = vst [vmem:[%s2205_s11 + $0xb8] sm:$0xff] %v1614_v59 }
 0x216   : > { %v1618_v11 = vpop.eup %1617  ;;  %1034 = vst [vmem:[%s2205_s11 + $0xc0] sm:$0xff] %v1616_v56 }
 0x217   : > { %v1620_v13 = vpop.eup %1619  ;;  %1035 = vst [vmem:[%s2205_s11 + $0xc8] sm:$0xff] %v1618_v11 }
 0x218   : > { %v1622_v12 = vpop.eup %1621  ;;  %1036 = vst [vmem:[%s2205_s11 + $0xd0] sm:$0xff] %v1620_v13 }
 0x219   : > { %v1624_v14 = vpop.eup %1623  ;;  %1037 = vst [vmem:[%s2205_s11 + $0xd8] sm:$0xff] %v1622_v12 }
 0x21a   : > { %v1626_v16 = vpop.eup %1625  ;;  %1038 = vst [vmem:[%s2205_s11 + $0xe0] sm:$0xff] %v1624_v14 }
 0x21b   : > { %v1628_v63 = vpop.eup %1627  ;;  %1039 = vst [vmem:[%s2205_s11 + $0xe8] sm:$0xff] %v1626_v16 }
 0x21c   : > { %v1630_v17 = vpop.eup %1629  ;;  %1040 = vst [vmem:[%s2205_s11 + $0xf0] sm:$0xff] %v1628_v63 }
 0x21d   : > { %1041 = vst [vmem:[%s2205_s11 + $0xf8] sm:$0xff] %v1630_v17 }
 0x21e PF: > { %s2737_s4 = sld [smem:[#allocation13_spill]]  ;;  %s1059_s7 = sshll.u32 %s2205_s11, 4  ;;  %s2584_s7 = int_to_ptr.vmem [resolvable:$true] %s1059_s7 }
 0x21f   : > { %s2738_s5 = sld [smem:[#allocation21_spill]]  ;;  %s2593_s3 = scalar_lea.sflag [#allocation4], %s271_s8 }
 0x220   : > { %s1691_s26 = scalar_lea.vmem %s2584_s7, 4096  ;;  %p2739_p2 = scmp.ne.s32.totalorder %s2721_s2, 0 }
 0x221   : > { %p1692_p1 = scmp.ne.s32.totalorder %s2584_s7, %s1691_s26 }
 0x223   : > { %p1693_p9 = pnand %p1692_p1, %p2739_p2 }
 0x224   : > { %s1252_s6 = sshll.u32 %s2737_s4, 6 }
 0x225   : > { %s1056_s30 = sadd.s32 %s1252_s6, %s2193_s29  ;;  %p1694_p0 = pneg %p1693_p9 }
 0x226   : > { %s1247_s22 = sshll.u32 %s1056_s30, 7  ;;  %s1865_s29 = smov [#allocation7]  }
 0x227   : > { %s2589_s15 = scalar_lea.hbm %s2738_s5, %s1247_s22  ;;  %s1695_s11 = sshll.u32 %s1865_s29, 4  ;;  %s1696_s11 = int_to_ptr.vmem [resolvable:$false] %s1695_s11 }
 0x228   : > { %s1697_s23 = scalar_lea.vmem %s1696_s11, 8192  ;;  %p1698_p3 = scmp.lt.s32.totalorder %s2584_s7, %s1696_s11 }
 0x229   : > { %p1699_p5 = scmp.lt.s32.totalorder %s1697_s23, %s1691_s26 }
 0x22b   : > { %p1700_p6 = por %p1699_p5, %p1698_p3 }
 0x22d   : > { %p1701_p8 = pnand %p1700_p6, %p1694_p0 }
 0x22f   : > { %1704 = shalt.err (!%p1701_p8)
}
 0x230   : > { %s1705_s8 = scalar_lea.hbm %s2589_s15, 4096  ;;  %s1709_s30 = scalar_lea.hbm %s2738_s5, 16384 }
 0x231   : > { %p1706_p10 = scmp.ne.s32.totalorder %s2589_s15, %s1705_s8  ;;  %p1710_p4 = scmp.lt.u32.totalorder %s2589_s15, %s2738_s5 }
 0x232   : > { %p1711_p12 = scmp.lt.u32.totalorder %s1709_s30, %s1705_s8  ;;  %p1713_p1 = scmp.lt.u32.totalorder %s1705_s8, %s2589_s15 }
 0x233   : > { %p1707_p11 = pnand %p1706_p10, %p2739_p2 }
 0x234   : > { %p1712_p13 = por %p1711_p12, %p1710_p4 }
 0x235   : > { %p1708_p7 = pneg %p1707_p11 }
 0x236   : > { %p1714_p9 = por %p1713_p1, %p1712_p13 }
 0x238   : > { %p1715_p0 = pnand %p1714_p9, %p1708_p7 }
 0x23a   : > { %1718 = shalt.err (!%p1715_p0)
}
 0x23b   : > { %s1866_s9 = smov 256   ;;  %s1867_s26 = smov 512  }
 0x23c   : > { %s1868_s29 = smov 16  }
 0x23d   : > { %1353 = dma.vmem_to_hbm [thread:$0]  (%p2739_p2), %s2584_s7, 4096, %s2589_s15, %s2593_s3, %s1866_s9, %s1867_s26, %s1868_s29  }
 0x23e PF: > { %p1367_p3 = scmp.ge.s32.totalorder %s1857_s27, 2  ;;  %s1074_s11 = sand.u32 1, %s1797_s12  }
 0x23f   : > { %p2740_p5 = scmp.ne.s32.totalorder %s2723_s28, 0  ;;  %s1075_s23 = scalar_lea.sflag [#allocation4], %s1074_s11 }
 0x241   : > { %p1363_p6 = pnand %p1367_p3, %p2740_p5 }
 0x243   : > { %1792 = dma.done.wait (!%p1363_p6), %s1075_s23, 4096  }
 0x244   : > { %1794 = vsyncadd (!%p1363_p6), %s1075_s23, 4294963200  ;;  %s22_s27 = sadd.s32 1, %s1857_s27   ;;  %s2742_s23 = sld [smem:[#allocation14_spill]] }
 0x245   : > { %p2622_p8 = scmp.ge.s32.totalorder %s22_s27, 10   ;;  %s2743_s2 = sld [smem:[#allocation15_spill]] }
 0x246   : > { %s2744_s28 = sld [smem:[#allocation17_spill]]  ;;  %s2745_s26 = sld [smem:[#allocation18_spill]] }
 0x247   : > { %s2746_s12 = smov %s1801_s13  ;;  %s2747_s13 = smov %s1805_s14 }
 0x248   : > { %s2748_s14 = smov %s2120_s0  ;;  %s2749_s15 = smov %s1813_s16 }
 0x249   : > { %s2750_s16 = smov %s1817_s17  ;;  %s2751_s17 = smov %s2101_s18 }
 0x24a   : > { %s2752_s18 = smov %s1825_s19  ;;  %s2753_s19 = smov %s1829_s20 }
 0x24b   : > { %s2754_s20 = smov %s2117_s21  ;;  %s2755_s21 = smov %s1845_s24 }
 0x24c   : > { %s2756_s22 = smov %s1849_s25  ;;  %s2757_s24 = smov %s2743_s2 }
 0x24d   : > { %s2758_s25 = smov %s2744_s28  ;;  %21 = sbr.rel (!%p2622_p8) target bundleno = 17 (0x11), region = 101 }
 0x254   :  { %1080 = vsyncpa [#allocation3], 1 }
 0x255   :  { %1082 = vsyncpa [#allocation3 + $0x1], 1 }
 0x256   :  { %1083 = vsyncpa [#allocation6], 1 }
 0x257   :  { %1085 = vsyncpa [#allocation6 + $0x1], 1 }
 0x258   :  { %1086 = vsyncpa [#allocation4], 1 }
 0x259   :  { %1088 = vsyncpa [#allocation4 + $0x1], 1 }

</bundles_post_ra>
